<compile_context>
chip_gen: v5e
topology: v5e:2x2
jax: 0.10.0
libtpu: 0.0.40
codegen_flags: <defaults>
</compile_context>

<pallas_src>
import functools

import numpy as np
import jax
import jax.numpy as jnp
from jax.experimental import pallas as pl
from jax.experimental.pallas import tpu as pltpu


_CONV_CHANNELS = (4, 8, 16, 32)   # conv1..conv4 out_channels (module spec)
_FC_HIDDEN = 128
_FC_OUT = 2


# ---------------------------------------------------------------------------
# Kernel body: whole network forward for one batch tile of TB images.
# ---------------------------------------------------------------------------
def _cnn_fwd_kernel(x_ref,
                    wb1_ref, b1_ref, m1_ref,
                    wb2_ref, b2_ref, m2_ref,
                    wb3_ref, b3_ref, m3_ref,
                    wb4_ref, b4_ref, m4_ref,
                    fc1w_ref, fc1b_ref, fc2w_ref, fc2b_ref,
                    o_ref,
                    stg1_ref, stg2_ref, stg3_ref, stg4_ref,
                    act2_ref, act3_ref, act4_ref, act5_ref,
                    *, layer_cfg, fc_cfg):
    wband = (wb1_ref, wb2_ref, wb3_ref, wb4_ref)
    bias = (b1_ref, b2_ref, b3_ref, b4_ref)
    rmask = (m1_ref, m2_ref, m3_ref, m4_ref)
    stg = (stg1_ref, stg2_ref, stg3_ref, stg4_ref)
    nxt = (act2_ref, act3_ref, act4_ref, act5_ref)

    src = x_ref
    for l, (nc, lout, cout, nr_next) in enumerate(layer_cfg):
        # conv3x3(stride 1, pad 1): 3 row-shifted slices x banded weight
        # matmuls.  dw taps + column zero padding live inside the trace-time
        # banded weights; dh zero padding comes from the per-image pad rows.
        acc = jnp.dot(src[pl.ds(0, nc), :], wband[l][0],
                      preferred_element_type=jnp.float32)
        acc = acc + jnp.dot(src[pl.ds(1, nc), :], wband[l][1],
                            preferred_element_type=jnp.float32)
        acc = acc + jnp.dot(src[pl.ds(2, nc), :], wband[l][2],
                            preferred_element_type=jnp.float32)
        a = jnp.maximum(acc + bias[l][...], 0.0)            # bias + ReLU
        stg[l][...] = a

        # maxpool 2x2 / stride 2.
        npm1 = nr_next - 1
        # h direction: two stride-2 sublane reads + max.  The row bookkeeping
        # makes this land directly in the next stage's padded layout.
        rmax = jnp.maximum(stg[l][pl.ds(0, npm1, stride=2), :],
                           stg[l][pl.ds(1, npm1, stride=2), :])
        # w direction: the partner column sits `cout` lanes to the right.
        shifted = jnp.concatenate([rmax[:, cout:], rmax[:, :cout]], axis=1)
        pooled = jnp.maximum(rmax, shifted)
        # Zero the next stage's pad rows (hoisted trace-time constant mask).
        pooled = pooled * rmask[l][...]

        nxt[l][pl.ds(0, npm1), :] = pooled
        nxt[l][pl.ds(npm1, 1), :] = jnp.zeros((1, lout), jnp.float32)
        src = nxt[l]

    # fc1 + ReLU + fc2 on the whole batch tile.
    tb, n_h, block5 = fc_cfg
    h = jnp.zeros((tb, _FC_HIDDEN), jnp.float32)
    for r in range(n_h):                                    # 1 iteration for 16x16
        feats = src[pl.ds(r, tb, stride=block5), :]         # (TB, lanes)
        h = h + jnp.dot(feats, fc1w_ref[r],
                        preferred_element_type=jnp.float32)
    h = jnp.maximum(h + fc1b_ref[...], 0.0)
    out = jnp.dot(h, fc2w_ref[...],
                  preferred_element_type=jnp.float32) + fc2b_ref[...]
    o_ref[...] = out.astype(o_ref.dtype)


# ---------------------------------------------------------------------------
# Trace-time constant packing (all hoisted out of the kernel body).
# ---------------------------------------------------------------------------
def _banded_conv_weight(wconv, w_cols, spread):
    """(3,3,Cin,Cout) kernel -> (3, spread*w_cols*Cin, w_cols*Cout) banded mats.

    Tap kh contracts a whole (w, c) lane row against band kh; the column (dw)
    structure and its zero padding are encoded in the band pattern.
    """
    bands = []
    for kh in range(3):
        term = None
        for kw in range(3):
            sel = np.zeros((spread * w_cols, w_cols), np.float32)
            for w in range(w_cols):
                wi = w + kw - 1
                if 0 <= wi < w_cols:
                    sel[spread * wi, w] = 1.0
            t = jnp.kron(jnp.asarray(sel), wconv[kh, kw])
            term = t if term is None else term + t
        bands.append(term)
    return jnp.stack(bands)


def _row_mask(tb, block, pad_top, n_real):
    n = tb * block - 1
    j = np.arange(n)
    m = ((j % block) >= pad_top) & ((j % block) < pad_top + n_real)
    return jnp.asarray(m.astype(np.float32).reshape(n, 1))


def _pack_fc1(fc1_w, n_h, n_w):
    """PyTorch (c,h,w)-ordered fc1 rows -> (n_h, 2*n_w*32, 128), lane packed."""
    l5 = 2 * n_w * 32
    idx = np.zeros((n_h, l5), np.int32)
    live = np.zeros((n_h, l5, 1), np.float32)
    for hh in range(n_h):
        for ww in range(n_w):
            for c in range(32):
                lane = 2 * ww * 32 + c
                idx[hh, lane] = c * (n_h * n_w) + hh * n_w + ww
                live[hh, lane, 0] = 1.0
    return fc1_w[jnp.asarray(idx)] * jnp.asarray(live)


# ---------------------------------------------------------------------------
# Wrapper: one pallas_call for the whole network.
# ---------------------------------------------------------------------------
def cnn_regression_forward(params, x_nchw, *, batch_tile=8):
    B, cin0, H0, W0 = x_nchw.shape
    assert H0 % 16 == 0 and W0 % 16 == 0, "spatial dims must be divisible by 16"
    n_h, n_w = H0 // 16, W0 // 16
    chans = (cin0,) + _CONV_CHANNELS

    # Batch tile (keep TB <= B/2 on v7x for >=2 parallel grid steps; the demo
    # batch is tiny so we just clamp).  Raise batch_tile for real batches.
    tb = max(1, min(batch_tile, B))
    b_pad = -(-B // tb) * tb
    grid = (b_pad // tb,)

    # Per-stage row bookkeeping (stage t = input of conv t; stage 5 = FC feats).
    # block[t] rows per image, p[t] leading zero-pad rows, chosen so a global
    # stride-2 read of stage-t conv output lands exactly in stage t+1's layout.
    blocks = {t: (n_h + 1) * (1 << (5 - t)) for t in range(1, 6)}
    pads = {t: (1 << (5 - t)) - 1 for t in range(1, 5)}
    pads[5] = 0
    h_real = {t: H0 >> (t - 1) for t in range(1, 5)}
    h_real[5] = n_h
    w_cols = {t: W0 >> (t - 1) for t in range(1, 5)}
    nrows = {t: tb * blocks[t] for t in range(1, 6)}

    lane_in = {1: W0 * cin0}
    lane_out = {}
    for t in range(1, 5):
        lane_out[t] = w_cols[t] * chans[t]
        if t < 4:
            lane_in[t + 1] = lane_out[t]
    l5 = lane_out[4]

    # ---- host-side packing of the input + trace-time constants ------------
    x = jnp.transpose(x_nchw.astype(jnp.float32), (0, 2, 3, 1))     # NHWC
    x = x.reshape(B, H0, W0 * cin0)
    q1 = blocks[1] - h_real[1] - pads[1]
    x = jnp.pad(x, ((0, b_pad - B), (pads[1], q1), (0, 0)))
    x = x.reshape(b_pad * blocks[1], W0 * cin0)

    inputs = [x]
    in_specs = [pl.BlockSpec((tb * blocks[1], W0 * cin0), lambda i: (i, 0))]
    layer_cfg = []
    for t in range(1, 5):
        spread = 1 if t == 1 else 2
        wb = _banded_conv_weight(params[f"conv{t}_w"], w_cols[t], spread)
        bb = jnp.tile(params[f"conv{t}_b"], w_cols[t]).reshape(1, lane_out[t])
        mk = _row_mask(tb, blocks[t + 1], pads[t + 1], h_real[t + 1])
        inputs += [wb, bb, mk]
        in_specs += [
            pl.BlockSpec((3, lane_in[t], lane_out[t]), lambda i: (0, 0, 0)),
            pl.BlockSpec((1, lane_out[t]), lambda i: (0, 0)),
            pl.BlockSpec((nrows[t + 1] - 1, 1), lambda i: (0, 0)),
        ]
        layer_cfg.append((nrows[t] - 2, lane_out[t], chans[t], nrows[t + 1]))

    fc1p = _pack_fc1(params["fc1_w"], n_h, n_w)
    inputs += [fc1p,
               params["fc1_b"].reshape(1, _FC_HIDDEN),
               params["fc2_w"],
               params["fc2_b"].reshape(1, _FC_OUT)]
    in_specs += [
        pl.BlockSpec((n_h, l5, _FC_HIDDEN), lambda i: (0, 0, 0)),
        pl.BlockSpec((1, _FC_HIDDEN), lambda i: (0, 0)),
        pl.BlockSpec((_FC_HIDDEN, _FC_OUT), lambda i: (0, 0)),
        pl.BlockSpec((1, _FC_OUT), lambda i: (0, 0)),
    ]

    scratch_shapes = (
        [pltpu.VMEM((nrows[t] - 2, lane_out[t]), jnp.float32)      # conv stage
         for t in range(1, 5)]
        + [pltpu.VMEM((nrows[t + 1], lane_out[t]), jnp.float32)    # next input
           for t in range(1, 5)]
    )

    out = pl.pallas_call(
        functools.partial(_cnn_fwd_kernel,
                          layer_cfg=tuple(layer_cfg),
                          fc_cfg=(tb, n_h, blocks[5])),
        grid=grid,
        out_shape=jax.ShapeDtypeStruct((b_pad, _FC_OUT), jnp.float32),
        in_specs=in_specs,
        out_specs=pl.BlockSpec((tb, _FC_OUT), lambda i: (i, 0)),
        scratch_shapes=scratch_shapes,
        compiler_params=pltpu.CompilerParams(
            dimension_semantics=("parallel",)),
    )(*inputs)
    return out[:B]


# ---------------------------------------------------------------------------
# Parameters (PyTorch-default-style uniform +-1/sqrt(fan_in) init)
# ---------------------------------------------------------------------------
def init_params(key, image_size):
    cin, H, W = image_size
    assert H % 16 == 0 and W % 16 == 0, "spatial dims must be divisible by 16"
    chans = (cin,) + _CONV_CHANNELS
    fc1_in_module = int(16 * (H // 16) * (W // 8))   # module's bookkeeping
    fc1_in = 32 * (H // 16) * (W // 16)              # true flattened size
    assert fc1_in_module == fc1_in

    params = {}
    keys = jax.random.split(key, 12)
    k = 0
    for i in range(4):
        fan_in = chans[i] * 9
        bound = 1.0 / float(fan_in) ** 0.5
        params[f"conv{i + 1}_w"] = jax.random.uniform(
            keys[k], (3, 3, chans[i], chans[i + 1]), jnp.float32, -bound, bound)
        k += 1
        params[f"conv{i + 1}_b"] = jax.random.uniform(
            keys[k], (chans[i + 1],), jnp.float32, -bound, bound)
        k += 1
    for name, (fi, fo) in (("fc1", (fc1_in, _FC_HIDDEN)),
                           ("fc2", (_FC_HIDDEN, _FC_OUT))):
        bound = 1.0 / float(fi) ** 0.5
        params[f"{name}_w"] = jax.random.uniform(
            keys[k], (fi, fo), jnp.float32, -bound, bound)
        k += 1
        params[f"{name}_b"] = jax.random.uniform(
            keys[k], (fo,), jnp.float32, -bound, bound)
        k += 1
    return params


# ---------------------------------------------------------------------------
# Pure-JAX reference (XLA conv / reduce_window) for a correctness check.
# ---------------------------------------------------------------------------
def _reference_forward(params, x_nchw):
    x = jnp.transpose(x_nchw.astype(jnp.float32), (0, 2, 3, 1))     # NHWC
    for l in range(1, 5):
        x = jax.lax.conv_general_dilated(
            x, params[f"conv{l}_w"], window_strides=(1, 1),
            padding=((1, 1), (1, 1)),
            dimension_numbers=("NHWC", "HWIO", "NHWC"))
        x = jnp.maximum(x + params[f"conv{l}_b"], 0.0)
        x = jax.lax.reduce_window(x, -jnp.inf, jax.lax.max,
                                  (1, 2, 2, 1), (1, 2, 2, 1), "VALID")
    feats = jnp.transpose(x, (0, 3, 1, 2)).reshape(x.shape[0], -1)  # (c,h,w)
    h = jnp.maximum(feats @ params["fc1_w"] + params["fc1_b"], 0.0)
    return h @ params["fc2_w"] + params["fc2_b"]


if __name__ == "__main__":
    # Small config consistent with the module: image_size=(4, 16, 16), batch=2.
    image_size = (4, 16, 16)
    key = jax.random.PRNGKey(0)
    pkey, xkey = jax.random.split(key)
    params = init_params(pkey, image_size)
    x = jax.random.normal(xkey, (2,) + image_size, jnp.float32)

    fwd = jax.jit(cnn_regression_forward)
    out = fwd(params, x)
    jax.block_until_ready(out)
    assert out.shape == (2, 2), out.shape
    assert out.dtype == jnp.float32
    assert bool(jnp.all(jnp.isfinite(out)))

    ref = _reference_forward(params, x)
    assert bool(jnp.allclose(out, ref, rtol=5e-2, atol=5e-2)), (out, ref)

    print("KERNEL_OK")
</pallas_src>

<mosaic_0001>
module attributes {stable_mosaic.version = 11 : i64} {
  func.func @_cnn_fwd_kernel(%arg0: i32, %arg1: memref<64x64xf32, #tpu.memory_space<vmem>>, %arg2: memref<3x64x64xf32, #tpu.memory_space<vmem>>, %arg3: memref<1x64xf32, #tpu.memory_space<vmem>>, %arg4: memref<31x1xf32, #tpu.memory_space<vmem>>, %arg5: memref<3x64x64xf32, #tpu.memory_space<vmem>>, %arg6: memref<1x64xf32, #tpu.memory_space<vmem>>, %arg7: memref<15x1xf32, #tpu.memory_space<vmem>>, %arg8: memref<3x64x64xf32, #tpu.memory_space<vmem>>, %arg9: memref<1x64xf32, #tpu.memory_space<vmem>>, %arg10: memref<7x1xf32, #tpu.memory_space<vmem>>, %arg11: memref<3x64x64xf32, #tpu.memory_space<vmem>>, %arg12: memref<1x64xf32, #tpu.memory_space<vmem>>, %arg13: memref<3x1xf32, #tpu.memory_space<vmem>>, %arg14: memref<1x64x128xf32, #tpu.memory_space<vmem>>, %arg15: memref<1x128xf32, #tpu.memory_space<vmem>>, %arg16: memref<128x2xf32, #tpu.memory_space<vmem>>, %arg17: memref<1x2xf32, #tpu.memory_space<vmem>>, %arg18: memref<2x2xf32, #tpu.memory_space<vmem>>, %arg19: memref<62x64xf32, #tpu.memory_space<vmem>>, %arg20: memref<30x64xf32, #tpu.memory_space<vmem>>, %arg21: memref<14x64xf32, #tpu.memory_space<vmem>>, %arg22: memref<6x64xf32, #tpu.memory_space<vmem>>, %arg23: memref<32x64xf32, #tpu.memory_space<vmem>>, %arg24: memref<16x64xf32, #tpu.memory_space<vmem>>, %arg25: memref<8x64xf32, #tpu.memory_space<vmem>>, %arg26: memref<4x64xf32, #tpu.memory_space<vmem>>) attributes {dimension_semantics = [#tpu.dimension_semantics<parallel>], iteration_bounds = array<i64: 1>, scalar_prefetch = 0 : i64, scratch_operands = 8 : i64, tpu.core_type = #tpu.core_type<tc>, window_params = [{transform_indices = @transform_0, window_bounds = array<i64: 64, 64>}, {pipeline_mode = #tpu.pipeline_mode<synchronous>, transform_indices = @transform_1, window_bounds = array<i64: 3, 64, 64>}, {pipeline_mode = #tpu.pipeline_mode<synchronous>, transform_indices = @transform_2, window_bounds = array<i64: 1, 64>}, {pipeline_mode = #tpu.pipeline_mode<synchronous>, transform_indices = @transform_3, window_bounds = array<i64: 31, 1>}, {pipeline_mode = #tpu.pipeline_mode<synchronous>, transform_indices = @transform_4, window_bounds = array<i64: 3, 64, 64>}, {pipeline_mode = #tpu.pipeline_mode<synchronous>, transform_indices = @transform_5, window_bounds = array<i64: 1, 64>}, {pipeline_mode = #tpu.pipeline_mode<synchronous>, transform_indices = @transform_6, window_bounds = array<i64: 15, 1>}, {pipeline_mode = #tpu.pipeline_mode<synchronous>, transform_indices = @transform_7, window_bounds = array<i64: 3, 64, 64>}, {pipeline_mode = #tpu.pipeline_mode<synchronous>, transform_indices = @transform_8, window_bounds = array<i64: 1, 64>}, {pipeline_mode = #tpu.pipeline_mode<synchronous>, transform_indices = @transform_9, window_bounds = array<i64: 7, 1>}, {pipeline_mode = #tpu.pipeline_mode<synchronous>, transform_indices = @transform_10, window_bounds = array<i64: 3, 64, 64>}, {pipeline_mode = #tpu.pipeline_mode<synchronous>, transform_indices = @transform_11, window_bounds = array<i64: 1, 64>}, {pipeline_mode = #tpu.pipeline_mode<synchronous>, transform_indices = @transform_12, window_bounds = array<i64: 3, 1>}, {pipeline_mode = #tpu.pipeline_mode<synchronous>, transform_indices = @transform_13, window_bounds = array<i64: 1, 64, 128>}, {pipeline_mode = #tpu.pipeline_mode<synchronous>, transform_indices = @transform_14, window_bounds = array<i64: 1, 128>}, {pipeline_mode = #tpu.pipeline_mode<synchronous>, transform_indices = @transform_15, window_bounds = array<i64: 128, 2>}, {pipeline_mode = #tpu.pipeline_mode<synchronous>, transform_indices = @transform_16, window_bounds = array<i64: 1, 2>}, {transform_indices = @transform_17, window_bounds = array<i64: 2, 2>}]} {
    %c0 = arith.constant 0 : index
    %c0_0 = arith.constant 0 : index
    %0 = vector.load %arg1[%c0, %c0_0] : memref<64x64xf32, #tpu.memory_space<vmem>>, vector<62x64xf32>
    %c0_1 = arith.constant 0 : index
    %c0_2 = arith.constant 0 : index
    %c0_3 = arith.constant 0 : index
    %1 = vector.load %arg2[%c0_1, %c0_2, %c0_3] : memref<3x64x64xf32, #tpu.memory_space<vmem>>, vector<1x64x64xf32>
    %2 = vector.shape_cast %1 : vector<1x64x64xf32> to vector<64x64xf32>
    %cst = arith.constant dense<0.000000e+00> : vector<62x64xf32>
    %3 = tpu.matmul %0, %2, %cst {dimension_numbers = #tpu.dot_dimension_numbers<[1], [0], [0], [1], [0, 0, 1, 1], [], []>} : vector<62x64xf32>, vector<64x64xf32>, vector<62x64xf32> -> vector<62x64xf32>
    %c1 = arith.constant 1 : index
    %c0_4 = arith.constant 0 : index
    %4 = vector.load %arg1[%c1, %c0_4] : memref<64x64xf32, #tpu.memory_space<vmem>>, vector<62x64xf32>
    %c1_5 = arith.constant 1 : index
    %c0_6 = arith.constant 0 : index
    %c0_7 = arith.constant 0 : index
    %5 = vector.load %arg2[%c1_5, %c0_6, %c0_7] : memref<3x64x64xf32, #tpu.memory_space<vmem>>, vector<1x64x64xf32>
    %6 = vector.shape_cast %5 : vector<1x64x64xf32> to vector<64x64xf32>
    %cst_8 = arith.constant dense<0.000000e+00> : vector<62x64xf32>
    %7 = tpu.matmul %4, %6, %cst_8 {dimension_numbers = #tpu.dot_dimension_numbers<[1], [0], [0], [1], [0, 0, 1, 1], [], []>} : vector<62x64xf32>, vector<64x64xf32>, vector<62x64xf32> -> vector<62x64xf32>
    %8 = arith.addf %3, %7 : vector<62x64xf32>
    %c2 = arith.constant 2 : index
    %c0_9 = arith.constant 0 : index
    %9 = vector.load %arg1[%c2, %c0_9] : memref<64x64xf32, #tpu.memory_space<vmem>>, vector<62x64xf32>
    %c2_10 = arith.constant 2 : index
    %c0_11 = arith.constant 0 : index
    %c0_12 = arith.constant 0 : index
    %10 = vector.load %arg2[%c2_10, %c0_11, %c0_12] : memref<3x64x64xf32, #tpu.memory_space<vmem>>, vector<1x64x64xf32>
    %11 = vector.shape_cast %10 : vector<1x64x64xf32> to vector<64x64xf32>
    %cst_13 = arith.constant dense<0.000000e+00> : vector<62x64xf32>
    %12 = tpu.matmul %9, %11, %cst_13 {dimension_numbers = #tpu.dot_dimension_numbers<[1], [0], [0], [1], [0, 0, 1, 1], [], []>} : vector<62x64xf32>, vector<64x64xf32>, vector<62x64xf32> -> vector<62x64xf32>
    %13 = arith.addf %8, %12 : vector<62x64xf32>
    %c0_14 = arith.constant 0 : index
    %c0_15 = arith.constant 0 : index
    %14 = vector.load %arg3[%c0_14, %c0_15] : memref<1x64xf32, #tpu.memory_space<vmem>>, vector<1x64xf32>
    %15 = vector.broadcast %14 : vector<1x64xf32> to vector<62x64xf32>
    %16 = arith.addf %13, %15 : vector<62x64xf32>
    %cst_16 = arith.constant 0.000000e+00 : f32
    %17 = vector.broadcast %cst_16 : f32 to vector<62x64xf32>
    %18 = arith.maximumf %16, %17 : vector<62x64xf32>
    %c0_17 = arith.constant 0 : index
    %c0_18 = arith.constant 0 : index
    %19 = vector.load %arg19[%c0_17, %c0_18] : memref<62x64xf32, #tpu.memory_space<vmem>>, vector<62x64xf32>
    tpu.vector_store %arg19[%c0_17, %c0_18], %18 {strides = array<i32>} : memref<62x64xf32, #tpu.memory_space<vmem>>, vector<62x64xf32>,
    %c0_19 = arith.constant 0 : index
    %c0_20 = arith.constant 0 : index
    %20 = tpu.strided_load %arg19[%c0_19, %c0_20] {strides = array<i32: 2, 1>} : memref<62x64xf32, #tpu.memory_space<vmem>>, vector<31x64xf32>
    %c1_21 = arith.constant 1 : index
    %c0_22 = arith.constant 0 : index
    %21 = tpu.strided_load %arg19[%c1_21, %c0_22] {strides = array<i32: 2, 1>} : memref<62x64xf32, #tpu.memory_space<vmem>>, vector<31x64xf32>
    %22 = arith.maximumf %20, %21 : vector<31x64xf32>
    %23 = vector.extract_strided_slice %22 {offsets = [0, 4], sizes = [31, 60], strides = [1, 1]} : vector<31x64xf32> to vector<31x60xf32>
    %24 = vector.extract_strided_slice %22 {offsets = [0, 0], sizes = [31, 4], strides = [1, 1]} : vector<31x64xf32> to vector<31x4xf32>
    %25 = tpu.concatenate %23, %24 in 1 : vector<31x60xf32>, vector<31x4xf32> -> vector<31x64xf32>
    %26 = arith.maximumf %22, %25 : vector<31x64xf32>
    %c0_23 = arith.constant 0 : index
    %c0_24 = arith.constant 0 : index
    %27 = vector.load %arg4[%c0_23, %c0_24] : memref<31x1xf32, #tpu.memory_space<vmem>>, vector<31x1xf32>
    %28 = vector.broadcast %27 : vector<31x1xf32> to vector<31x64xf32>
    %29 = arith.mulf %26, %28 : vector<31x64xf32>
    %c0_25 = arith.constant 0 : index
    %c0_26 = arith.constant 0 : index
    %30 = vector.load %arg23[%c0_25, %c0_26] : memref<32x64xf32, #tpu.memory_space<vmem>>, vector<31x64xf32>
    tpu.vector_store %arg23[%c0_25, %c0_26], %29 {strides = array<i32>} : memref<32x64xf32, #tpu.memory_space<vmem>>, vector<31x64xf32>,
    %cst_27 = arith.constant 0.000000e+00 : f32
    %31 = vector.broadcast %cst_27 : f32 to vector<1x64xf32>
    %c31 = arith.constant 31 : index
    %c0_28 = arith.constant 0 : index
    %32 = vector.load %arg23[%c31, %c0_28] : memref<32x64xf32, #tpu.memory_space<vmem>>, vector<1x64xf32>
    tpu.vector_store %arg23[%c31, %c0_28], %31 {strides = array<i32>} : memref<32x64xf32, #tpu.memory_space<vmem>>, vector<1x64xf32>,
    %c0_29 = arith.constant 0 : index
    %c0_30 = arith.constant 0 : index
    %33 = vector.load %arg23[%c0_29, %c0_30] : memref<32x64xf32, #tpu.memory_space<vmem>>, vector<30x64xf32>
    %c0_31 = arith.constant 0 : index
    %c0_32 = arith.constant 0 : index
    %c0_33 = arith.constant 0 : index
    %34 = vector.load %arg5[%c0_31, %c0_32, %c0_33] : memref<3x64x64xf32, #tpu.memory_space<vmem>>, vector<1x64x64xf32>
    %35 = vector.shape_cast %34 : vector<1x64x64xf32> to vector<64x64xf32>
    %cst_34 = arith.constant dense<0.000000e+00> : vector<30x64xf32>
    %36 = tpu.matmul %33, %35, %cst_34 {dimension_numbers = #tpu.dot_dimension_numbers<[1], [0], [0], [1], [0, 0, 1, 1], [], []>} : vector<30x64xf32>, vector<64x64xf32>, vector<30x64xf32> -> vector<30x64xf32>
    %c1_35 = arith.constant 1 : index
    %c0_36 = arith.constant 0 : index
    %37 = vector.load %arg23[%c1_35, %c0_36] : memref<32x64xf32, #tpu.memory_space<vmem>>, vector<30x64xf32>
    %c1_37 = arith.constant 1 : index
    %c0_38 = arith.constant 0 : index
    %c0_39 = arith.constant 0 : index
    %38 = vector.load %arg5[%c1_37, %c0_38, %c0_39] : memref<3x64x64xf32, #tpu.memory_space<vmem>>, vector<1x64x64xf32>
    %39 = vector.shape_cast %38 : vector<1x64x64xf32> to vector<64x64xf32>
    %cst_40 = arith.constant dense<0.000000e+00> : vector<30x64xf32>
    %40 = tpu.matmul %37, %39, %cst_40 {dimension_numbers = #tpu.dot_dimension_numbers<[1], [0], [0], [1], [0, 0, 1, 1], [], []>} : vector<30x64xf32>, vector<64x64xf32>, vector<30x64xf32> -> vector<30x64xf32>
    %41 = arith.addf %36, %40 : vector<30x64xf32>
    %c2_41 = arith.constant 2 : index
    %c0_42 = arith.constant 0 : index
    %42 = vector.load %arg23[%c2_41, %c0_42] : memref<32x64xf32, #tpu.memory_space<vmem>>, vector<30x64xf32>
    %c2_43 = arith.constant 2 : index
    %c0_44 = arith.constant 0 : index
    %c0_45 = arith.constant 0 : index
    %43 = vector.load %arg5[%c2_43, %c0_44, %c0_45] : memref<3x64x64xf32, #tpu.memory_space<vmem>>, vector<1x64x64xf32>
    %44 = vector.shape_cast %43 : vector<1x64x64xf32> to vector<64x64xf32>
    %cst_46 = arith.constant dense<0.000000e+00> : vector<30x64xf32>
    %45 = tpu.matmul %42, %44, %cst_46 {dimension_numbers = #tpu.dot_dimension_numbers<[1], [0], [0], [1], [0, 0, 1, 1], [], []>} : vector<30x64xf32>, vector<64x64xf32>, vector<30x64xf32> -> vector<30x64xf32>
    %46 = arith.addf %41, %45 : vector<30x64xf32>
    %c0_47 = arith.constant 0 : index
    %c0_48 = arith.constant 0 : index
    %47 = vector.load %arg6[%c0_47, %c0_48] : memref<1x64xf32, #tpu.memory_space<vmem>>, vector<1x64xf32>
    %48 = vector.broadcast %47 : vector<1x64xf32> to vector<30x64xf32>
    %49 = arith.addf %46, %48 : vector<30x64xf32>
    %cst_49 = arith.constant 0.000000e+00 : f32
    %50 = vector.broadcast %cst_49 : f32 to vector<30x64xf32>
    %51 = arith.maximumf %49, %50 : vector<30x64xf32>
    %c0_50 = arith.constant 0 : index
    %c0_51 = arith.constant 0 : index
    %52 = vector.load %arg20[%c0_50, %c0_51] : memref<30x64xf32, #tpu.memory_space<vmem>>, vector<30x64xf32>
    tpu.vector_store %arg20[%c0_50, %c0_51], %51 {strides = array<i32>} : memref<30x64xf32, #tpu.memory_space<vmem>>, vector<30x64xf32>,
    %c0_52 = arith.constant 0 : index
    %c0_53 = arith.constant 0 : index
    %53 = tpu.strided_load %arg20[%c0_52, %c0_53] {strides = array<i32: 2, 1>} : memref<30x64xf32, #tpu.memory_space<vmem>>, vector<15x64xf32>
    %c1_54 = arith.constant 1 : index
    %c0_55 = arith.constant 0 : index
    %54 = tpu.strided_load %arg20[%c1_54, %c0_55] {strides = array<i32: 2, 1>} : memref<30x64xf32, #tpu.memory_space<vmem>>, vector<15x64xf32>
    %55 = arith.maximumf %53, %54 : vector<15x64xf32>
    %56 = vector.extract_strided_slice %55 {offsets = [0, 8], sizes = [15, 56], strides = [1, 1]} : vector<15x64xf32> to vector<15x56xf32>
    %57 = vector.extract_strided_slice %55 {offsets = [0, 0], sizes = [15, 8], strides = [1, 1]} : vector<15x64xf32> to vector<15x8xf32>
    %58 = tpu.concatenate %56, %57 in 1 : vector<15x56xf32>, vector<15x8xf32> -> vector<15x64xf32>
    %59 = arith.maximumf %55, %58 : vector<15x64xf32>
    %c0_56 = arith.constant 0 : index
    %c0_57 = arith.constant 0 : index
    %60 = vector.load %arg7[%c0_56, %c0_57] : memref<15x1xf32, #tpu.memory_space<vmem>>, vector<15x1xf32>
    %61 = vector.broadcast %60 : vector<15x1xf32> to vector<15x64xf32>
    %62 = arith.mulf %59, %61 : vector<15x64xf32>
    %c0_58 = arith.constant 0 : index
    %c0_59 = arith.constant 0 : index
    %63 = vector.load %arg24[%c0_58, %c0_59] : memref<16x64xf32, #tpu.memory_space<vmem>>, vector<15x64xf32>
    tpu.vector_store %arg24[%c0_58, %c0_59], %62 {strides = array<i32>} : memref<16x64xf32, #tpu.memory_space<vmem>>, vector<15x64xf32>,
    %cst_60 = arith.constant 0.000000e+00 : f32
    %64 = vector.broadcast %cst_60 : f32 to vector<1x64xf32>
    %c15 = arith.constant 15 : index
    %c0_61 = arith.constant 0 : index
    %65 = vector.load %arg24[%c15, %c0_61] : memref<16x64xf32, #tpu.memory_space<vmem>>, vector<1x64xf32>
    tpu.vector_store %arg24[%c15, %c0_61], %64 {strides = array<i32>} : memref<16x64xf32, #tpu.memory_space<vmem>>, vector<1x64xf32>,
    %c0_62 = arith.constant 0 : index
    %c0_63 = arith.constant 0 : index
    %66 = vector.load %arg24[%c0_62, %c0_63] : memref<16x64xf32, #tpu.memory_space<vmem>>, vector<14x64xf32>
    %c0_64 = arith.constant 0 : index
    %c0_65 = arith.constant 0 : index
    %c0_66 = arith.constant 0 : index
    %67 = vector.load %arg8[%c0_64, %c0_65, %c0_66] : memref<3x64x64xf32, #tpu.memory_space<vmem>>, vector<1x64x64xf32>
    %68 = vector.shape_cast %67 : vector<1x64x64xf32> to vector<64x64xf32>
    %cst_67 = arith.constant dense<0.000000e+00> : vector<14x64xf32>
    %69 = tpu.matmul %66, %68, %cst_67 {dimension_numbers = #tpu.dot_dimension_numbers<[1], [0], [0], [1], [0, 0, 1, 1], [], []>} : vector<14x64xf32>, vector<64x64xf32>, vector<14x64xf32> -> vector<14x64xf32>
    %c1_68 = arith.constant 1 : index
    %c0_69 = arith.constant 0 : index
    %70 = vector.load %arg24[%c1_68, %c0_69] : memref<16x64xf32, #tpu.memory_space<vmem>>, vector<14x64xf32>
    %c1_70 = arith.constant 1 : index
    %c0_71 = arith.constant 0 : index
    %c0_72 = arith.constant 0 : index
    %71 = vector.load %arg8[%c1_70, %c0_71, %c0_72] : memref<3x64x64xf32, #tpu.memory_space<vmem>>, vector<1x64x64xf32>
    %72 = vector.shape_cast %71 : vector<1x64x64xf32> to vector<64x64xf32>
    %cst_73 = arith.constant dense<0.000000e+00> : vector<14x64xf32>
    %73 = tpu.matmul %70, %72, %cst_73 {dimension_numbers = #tpu.dot_dimension_numbers<[1], [0], [0], [1], [0, 0, 1, 1], [], []>} : vector<14x64xf32>, vector<64x64xf32>, vector<14x64xf32> -> vector<14x64xf32>
    %74 = arith.addf %69, %73 : vector<14x64xf32>
    %c2_74 = arith.constant 2 : index
    %c0_75 = arith.constant 0 : index
    %75 = vector.load %arg24[%c2_74, %c0_75] : memref<16x64xf32, #tpu.memory_space<vmem>>, vector<14x64xf32>
    %c2_76 = arith.constant 2 : index
    %c0_77 = arith.constant 0 : index
    %c0_78 = arith.constant 0 : index
    %76 = vector.load %arg8[%c2_76, %c0_77, %c0_78] : memref<3x64x64xf32, #tpu.memory_space<vmem>>, vector<1x64x64xf32>
    %77 = vector.shape_cast %76 : vector<1x64x64xf32> to vector<64x64xf32>
    %cst_79 = arith.constant dense<0.000000e+00> : vector<14x64xf32>
    %78 = tpu.matmul %75, %77, %cst_79 {dimension_numbers = #tpu.dot_dimension_numbers<[1], [0], [0], [1], [0, 0, 1, 1], [], []>} : vector<14x64xf32>, vector<64x64xf32>, vector<14x64xf32> -> vector<14x64xf32>
    %79 = arith.addf %74, %78 : vector<14x64xf32>
    %c0_80 = arith.constant 0 : index
    %c0_81 = arith.constant 0 : index
    %80 = vector.load %arg9[%c0_80, %c0_81] : memref<1x64xf32, #tpu.memory_space<vmem>>, vector<1x64xf32>
    %81 = vector.broadcast %80 : vector<1x64xf32> to vector<14x64xf32>
    %82 = arith.addf %79, %81 : vector<14x64xf32>
    %cst_82 = arith.constant 0.000000e+00 : f32
    %83 = vector.broadcast %cst_82 : f32 to vector<14x64xf32>
    %84 = arith.maximumf %82, %83 : vector<14x64xf32>
    %c0_83 = arith.constant 0 : index
    %c0_84 = arith.constant 0 : index
    %85 = vector.load %arg21[%c0_83, %c0_84] : memref<14x64xf32, #tpu.memory_space<vmem>>, vector<14x64xf32>
    tpu.vector_store %arg21[%c0_83, %c0_84], %84 {strides = array<i32>} : memref<14x64xf32, #tpu.memory_space<vmem>>, vector<14x64xf32>,
    %c0_85 = arith.constant 0 : index
    %c0_86 = arith.constant 0 : index
    %86 = tpu.strided_load %arg21[%c0_85, %c0_86] {strides = array<i32: 2, 1>} : memref<14x64xf32, #tpu.memory_space<vmem>>, vector<7x64xf32>
    %c1_87 = arith.constant 1 : index
    %c0_88 = arith.constant 0 : index
    %87 = tpu.strided_load %arg21[%c1_87, %c0_88] {strides = array<i32: 2, 1>} : memref<14x64xf32, #tpu.memory_space<vmem>>, vector<7x64xf32>
    %88 = arith.maximumf %86, %87 : vector<7x64xf32>
    %89 = vector.extract_strided_slice %88 {offsets = [0, 16], sizes = [7, 48], strides = [1, 1]} : vector<7x64xf32> to vector<7x48xf32>
    %90 = vector.extract_strided_slice %88 {offsets = [0, 0], sizes = [7, 16], strides = [1, 1]} : vector<7x64xf32> to vector<7x16xf32>
    %91 = tpu.concatenate %89, %90 in 1 : vector<7x48xf32>, vector<7x16xf32> -> vector<7x64xf32>
    %92 = arith.maximumf %88, %91 : vector<7x64xf32>
    %c0_89 = arith.constant 0 : index
    %c0_90 = arith.constant 0 : index
    %93 = vector.load %arg10[%c0_89, %c0_90] : memref<7x1xf32, #tpu.memory_space<vmem>>, vector<7x1xf32>
    %94 = vector.broadcast %93 : vector<7x1xf32> to vector<7x64xf32>
    %95 = arith.mulf %92, %94 : vector<7x64xf32>
    %c0_91 = arith.constant 0 : index
    %c0_92 = arith.constant 0 : index
    %96 = vector.load %arg25[%c0_91, %c0_92] : memref<8x64xf32, #tpu.memory_space<vmem>>, vector<7x64xf32>
    tpu.vector_store %arg25[%c0_91, %c0_92], %95 {strides = array<i32>} : memref<8x64xf32, #tpu.memory_space<vmem>>, vector<7x64xf32>,
    %cst_93 = arith.constant 0.000000e+00 : f32
    %97 = vector.broadcast %cst_93 : f32 to vector<1x64xf32>
    %c7 = arith.constant 7 : index
    %c0_94 = arith.constant 0 : index
    %98 = vector.load %arg25[%c7, %c0_94] : memref<8x64xf32, #tpu.memory_space<vmem>>, vector<1x64xf32>
    tpu.vector_store %arg25[%c7, %c0_94], %97 {strides = array<i32>} : memref<8x64xf32, #tpu.memory_space<vmem>>, vector<1x64xf32>,
    %c0_95 = arith.constant 0 : index
    %c0_96 = arith.constant 0 : index
    %99 = vector.load %arg25[%c0_95, %c0_96] : memref<8x64xf32, #tpu.memory_space<vmem>>, vector<6x64xf32>
    %c0_97 = arith.constant 0 : index
    %c0_98 = arith.constant 0 : index
    %c0_99 = arith.constant 0 : index
    %100 = vector.load %arg11[%c0_97, %c0_98, %c0_99] : memref<3x64x64xf32, #tpu.memory_space<vmem>>, vector<1x64x64xf32>
    %101 = vector.shape_cast %100 : vector<1x64x64xf32> to vector<64x64xf32>
    %cst_100 = arith.constant dense<0.000000e+00> : vector<6x64xf32>
    %102 = tpu.matmul %99, %101, %cst_100 {dimension_numbers = #tpu.dot_dimension_numbers<[1], [0], [0], [1], [0, 0, 1, 1], [], []>} : vector<6x64xf32>, vector<64x64xf32>, vector<6x64xf32> -> vector<6x64xf32>
    %c1_101 = arith.constant 1 : index
    %c0_102 = arith.constant 0 : index
    %103 = vector.load %arg25[%c1_101, %c0_102] : memref<8x64xf32, #tpu.memory_space<vmem>>, vector<6x64xf32>
    %c1_103 = arith.constant 1 : index
    %c0_104 = arith.constant 0 : index
    %c0_105 = arith.constant 0 : index
    %104 = vector.load %arg11[%c1_103, %c0_104, %c0_105] : memref<3x64x64xf32, #tpu.memory_space<vmem>>, vector<1x64x64xf32>
    %105 = vector.shape_cast %104 : vector<1x64x64xf32> to vector<64x64xf32>
    %cst_106 = arith.constant dense<0.000000e+00> : vector<6x64xf32>
    %106 = tpu.matmul %103, %105, %cst_106 {dimension_numbers = #tpu.dot_dimension_numbers<[1], [0], [0], [1], [0, 0, 1, 1], [], []>} : vector<6x64xf32>, vector<64x64xf32>, vector<6x64xf32> -> vector<6x64xf32>
    %107 = arith.addf %102, %106 : vector<6x64xf32>
    %c2_107 = arith.constant 2 : index
    %c0_108 = arith.constant 0 : index
    %108 = vector.load %arg25[%c2_107, %c0_108] : memref<8x64xf32, #tpu.memory_space<vmem>>, vector<6x64xf32>
    %c2_109 = arith.constant 2 : index
    %c0_110 = arith.constant 0 : index
    %c0_111 = arith.constant 0 : index
    %109 = vector.load %arg11[%c2_109, %c0_110, %c0_111] : memref<3x64x64xf32, #tpu.memory_space<vmem>>, vector<1x64x64xf32>
    %110 = vector.shape_cast %109 : vector<1x64x64xf32> to vector<64x64xf32>
    %cst_112 = arith.constant dense<0.000000e+00> : vector<6x64xf32>
    %111 = tpu.matmul %108, %110, %cst_112 {dimension_numbers = #tpu.dot_dimension_numbers<[1], [0], [0], [1], [0, 0, 1, 1], [], []>} : vector<6x64xf32>, vector<64x64xf32>, vector<6x64xf32> -> vector<6x64xf32>
    %112 = arith.addf %107, %111 : vector<6x64xf32>
    %c0_113 = arith.constant 0 : index
    %c0_114 = arith.constant 0 : index
    %113 = vector.load %arg12[%c0_113, %c0_114] : memref<1x64xf32, #tpu.memory_space<vmem>>, vector<1x64xf32>
    %114 = vector.broadcast %113 : vector<1x64xf32> to vector<6x64xf32>
    %115 = arith.addf %112, %114 : vector<6x64xf32>
    %cst_115 = arith.constant 0.000000e+00 : f32
    %116 = vector.broadcast %cst_115 : f32 to vector<6x64xf32>
    %117 = arith.maximumf %115, %116 : vector<6x64xf32>
    %c0_116 = arith.constant 0 : index
    %c0_117 = arith.constant 0 : index
    %118 = vector.load %arg22[%c0_116, %c0_117] : memref<6x64xf32, #tpu.memory_space<vmem>>, vector<6x64xf32>
    tpu.vector_store %arg22[%c0_116, %c0_117], %117 {strides = array<i32>} : memref<6x64xf32, #tpu.memory_space<vmem>>, vector<6x64xf32>,
    %c0_118 = arith.constant 0 : index
    %c0_119 = arith.constant 0 : index
    %119 = tpu.strided_load %arg22[%c0_118, %c0_119] {strides = array<i32: 2, 1>} : memref<6x64xf32, #tpu.memory_space<vmem>>, vector<3x64xf32>
    %c1_120 = arith.constant 1 : index
    %c0_121 = arith.constant 0 : index
    %120 = tpu.strided_load %arg22[%c1_120, %c0_121] {strides = array<i32: 2, 1>} : memref<6x64xf32, #tpu.memory_space<vmem>>, vector<3x64xf32>
    %121 = arith.maximumf %119, %120 : vector<3x64xf32>
    %122 = vector.extract_strided_slice %121 {offsets = [0, 32], sizes = [3, 32], strides = [1, 1]} : vector<3x64xf32> to vector<3x32xf32>
    %123 = vector.extract_strided_slice %121 {offsets = [0, 0], sizes = [3, 32], strides = [1, 1]} : vector<3x64xf32> to vector<3x32xf32>
    %124 = tpu.concatenate %122, %123 in 1 : vector<3x32xf32>, vector<3x32xf32> -> vector<3x64xf32>
    %125 = arith.maximumf %121, %124 : vector<3x64xf32>
    %c0_122 = arith.constant 0 : index
    %c0_123 = arith.constant 0 : index
    %126 = vector.load %arg13[%c0_122, %c0_123] : memref<3x1xf32, #tpu.memory_space<vmem>>, vector<3x1xf32>
    %127 = vector.broadcast %126 : vector<3x1xf32> to vector<3x64xf32>
    %128 = arith.mulf %125, %127 : vector<3x64xf32>
    %c0_124 = arith.constant 0 : index
    %c0_125 = arith.constant 0 : index
    %129 = vector.load %arg26[%c0_124, %c0_125] : memref<4x64xf32, #tpu.memory_space<vmem>>, vector<3x64xf32>
    tpu.vector_store %arg26[%c0_124, %c0_125], %128 {strides = array<i32>} : memref<4x64xf32, #tpu.memory_space<vmem>>, vector<3x64xf32>,
    %cst_126 = arith.constant 0.000000e+00 : f32
    %130 = vector.broadcast %cst_126 : f32 to vector<1x64xf32>
    %c3 = arith.constant 3 : index
    %c0_127 = arith.constant 0 : index
    %131 = vector.load %arg26[%c3, %c0_127] : memref<4x64xf32, #tpu.memory_space<vmem>>, vector<1x64xf32>
    tpu.vector_store %arg26[%c3, %c0_127], %130 {strides = array<i32>} : memref<4x64xf32, #tpu.memory_space<vmem>>, vector<1x64xf32>,
    %cst_128 = arith.constant 0.000000e+00 : f32
    %132 = vector.broadcast %cst_128 : f32 to vector<2x128xf32>
    %c0_129 = arith.constant 0 : index
    %c0_130 = arith.constant 0 : index
    %133 = tpu.strided_load %arg26[%c0_129, %c0_130] {strides = array<i32: 2, 1>} : memref<4x64xf32, #tpu.memory_space<vmem>>, vector<2x64xf32>
    %c0_131 = arith.constant 0 : index
    %c0_132 = arith.constant 0 : index
    %c0_133 = arith.constant 0 : index
    %134 = vector.load %arg14[%c0_131, %c0_132, %c0_133] : memref<1x64x128xf32, #tpu.memory_space<vmem>>, vector<1x64x128xf32>
    %135 = vector.shape_cast %134 : vector<1x64x128xf32> to vector<64x128xf32>
    %cst_134 = arith.constant dense<0.000000e+00> : vector<2x128xf32>
    %136 = tpu.matmul %133, %135, %cst_134 {dimension_numbers = #tpu.dot_dimension_numbers<[1], [0], [0], [1], [0, 0, 1, 1], [], []>} : vector<2x64xf32>, vector<64x128xf32>, vector<2x128xf32> -> vector<2x128xf32>
    %137 = arith.addf %132, %136 : vector<2x128xf32>
    %c0_135 = arith.constant 0 : index
    %c0_136 = arith.constant 0 : index
    %138 = vector.load %arg15[%c0_135, %c0_136] : memref<1x128xf32, #tpu.memory_space<vmem>>, vector<1x128xf32>
    %139 = vector.broadcast %138 : vector<1x128xf32> to vector<2x128xf32>
    %140 = arith.addf %137, %139 : vector<2x128xf32>
    %cst_137 = arith.constant 0.000000e+00 : f32
    %141 = vector.broadcast %cst_137 : f32 to vector<2x128xf32>
    %142 = arith.maximumf %140, %141 : vector<2x128xf32>
    %c0_138 = arith.constant 0 : index
    %c0_139 = arith.constant 0 : index
    %143 = vector.load %arg16[%c0_138, %c0_139] : memref<128x2xf32, #tpu.memory_space<vmem>>, vector<128x2xf32>
    %cst_140 = arith.constant dense<0.000000e+00> : vector<2x2xf32>
    %144 = tpu.matmul %142, %143, %cst_140 {dimension_numbers = #tpu.dot_dimension_numbers<[1], [0], [0], [1], [0, 0, 1, 1], [], []>} : vector<2x128xf32>, vector<128x2xf32>, vector<2x2xf32> -> vector<2x2xf32>
    %c0_141 = arith.constant 0 : index
    %c0_142 = arith.constant 0 : index
    %145 = vector.load %arg17[%c0_141, %c0_142] : memref<1x2xf32, #tpu.memory_space<vmem>>, vector<1x2xf32>
    %146 = vector.broadcast %145 : vector<1x2xf32> to vector<2x2xf32>
    %147 = arith.addf %144, %146 : vector<2x2xf32>
    %c0_143 = arith.constant 0 : index
    %c0_144 = arith.constant 0 : index
    %148 = vector.load %arg18[%c0_143, %c0_144] : memref<2x2xf32, #tpu.memory_space<vmem>>, vector<2x2xf32>
    tpu.vector_store %arg18[%c0_143, %c0_144], %147 {strides = array<i32>} : memref<2x2xf32, #tpu.memory_space<vmem>>, vector<2x2xf32>,
    return
  }
  func.func @transform_0(%arg0: i32) -> (i32, i32) {
    %c0_i32 = arith.constant 0 : i32
    %c0_i32_0 = arith.constant 0 : i32
    return %arg0, %c0_i32 : i32, i32
  }
  func.func @transform_1(%arg0: i32) -> (i32, i32, i32) {
    %c0_i32 = arith.constant 0 : i32
    %c0_i32_0 = arith.constant 0 : i32
    %c0_i32_1 = arith.constant 0 : i32
    %c0_i32_2 = arith.constant 0 : i32
    return %c0_i32, %c0_i32_0, %c0_i32_1 : i32, i32, i32
  }
  func.func @transform_2(%arg0: i32) -> (i32, i32) {
    %c0_i32 = arith.constant 0 : i32
    %c0_i32_0 = arith.constant 0 : i32
    %c0_i32_1 = arith.constant 0 : i32
    return %c0_i32, %c0_i32_0 : i32, i32
  }
  func.func @transform_3(%arg0: i32) -> (i32, i32) {
    %c0_i32 = arith.constant 0 : i32
    %c0_i32_0 = arith.constant 0 : i32
    %c0_i32_1 = arith.constant 0 : i32
    return %c0_i32, %c0_i32_0 : i32, i32
  }
  func.func @transform_4(%arg0: i32) -> (i32, i32, i32) {
    %c0_i32 = arith.constant 0 : i32
    %c0_i32_0 = arith.constant 0 : i32
    %c0_i32_1 = arith.constant 0 : i32
    %c0_i32_2 = arith.constant 0 : i32
    return %c0_i32, %c0_i32_0, %c0_i32_1 : i32, i32, i32
  }
  func.func @transform_5(%arg0: i32) -> (i32, i32) {
    %c0_i32 = arith.constant 0 : i32
    %c0_i32_0 = arith.constant 0 : i32
    %c0_i32_1 = arith.constant 0 : i32
    return %c0_i32, %c0_i32_0 : i32, i32
  }
  func.func @transform_6(%arg0: i32) -> (i32, i32) {
    %c0_i32 = arith.constant 0 : i32
    %c0_i32_0 = arith.constant 0 : i32
    %c0_i32_1 = arith.constant 0 : i32
    return %c0_i32, %c0_i32_0 : i32, i32
  }
  func.func @transform_7(%arg0: i32) -> (i32, i32, i32) {
    %c0_i32 = arith.constant 0 : i32
    %c0_i32_0 = arith.constant 0 : i32
    %c0_i32_1 = arith.constant 0 : i32
    %c0_i32_2 = arith.constant 0 : i32
    return %c0_i32, %c0_i32_0, %c0_i32_1 : i32, i32, i32
  }
  func.func @transform_8(%arg0: i32) -> (i32, i32) {
    %c0_i32 = arith.constant 0 : i32
    %c0_i32_0 = arith.constant 0 : i32
    %c0_i32_1 = arith.constant 0 : i32
    return %c0_i32, %c0_i32_0 : i32, i32
  }
  func.func @transform_9(%arg0: i32) -> (i32, i32) {
    %c0_i32 = arith.constant 0 : i32
    %c0_i32_0 = arith.constant 0 : i32
    %c0_i32_1 = arith.constant 0 : i32
    return %c0_i32, %c0_i32_0 : i32, i32
  }
  func.func @transform_10(%arg0: i32) -> (i32, i32, i32) {
    %c0_i32 = arith.constant 0 : i32
    %c0_i32_0 = arith.constant 0 : i32
    %c0_i32_1 = arith.constant 0 : i32
    %c0_i32_2 = arith.constant 0 : i32
    return %c0_i32, %c0_i32_0, %c0_i32_1 : i32, i32, i32
  }
  func.func @transform_11(%arg0: i32) -> (i32, i32) {
    %c0_i32 = arith.constant 0 : i32
    %c0_i32_0 = arith.constant 0 : i32
    %c0_i32_1 = arith.constant 0 : i32
    return %c0_i32, %c0_i32_0 : i32, i32
  }
  func.func @transform_12(%arg0: i32) -> (i32, i32) {
    %c0_i32 = arith.constant 0 : i32
    %c0_i32_0 = arith.constant 0 : i32
    %c0_i32_1 = arith.constant 0 : i32
    return %c0_i32, %c0_i32_0 : i32, i32
  }
  func.func @transform_13(%arg0: i32) -> (i32, i32, i32) {
    %c0_i32 = arith.constant 0 : i32
    %c0_i32_0 = arith.constant 0 : i32
    %c0_i32_1 = arith.constant 0 : i32
    %c0_i32_2 = arith.constant 0 : i32
    return %c0_i32, %c0_i32_0, %c0_i32_1 : i32, i32, i32
  }
  func.func @transform_14(%arg0: i32) -> (i32, i32) {
    %c0_i32 = arith.constant 0 : i32
    %c0_i32_0 = arith.constant 0 : i32
    %c0_i32_1 = arith.constant 0 : i32
    return %c0_i32, %c0_i32_0 : i32, i32
  }
  func.func @transform_15(%arg0: i32) -> (i32, i32) {
    %c0_i32 = arith.constant 0 : i32
    %c0_i32_0 = arith.constant 0 : i32
    %c0_i32_1 = arith.constant 0 : i32
    return %c0_i32, %c0_i32_0 : i32, i32
  }
  func.func @transform_16(%arg0: i32) -> (i32, i32) {
    %c0_i32 = arith.constant 0 : i32
    %c0_i32_0 = arith.constant 0 : i32
    %c0_i32_1 = arith.constant 0 : i32
    return %c0_i32, %c0_i32_0 : i32, i32
  }
  func.func @transform_17(%arg0: i32) -> (i32, i32) {
    %c0_i32 = arith.constant 0 : i32
    %c0_i32_0 = arith.constant 0 : i32
    return %arg0, %c0_i32 : i32, i32
  }
}

</mosaic_0001>

<bundles_post_ra>
// kernel: tile.23
= control target key start
LH: loop header
LB: loop body
LE: loop exit
PB: predicated region body
PF: predicated region fallthrough
CT: control target
= control target key end

     0   :  { %s28_s0 = inlined_call_operand.vmem [shape: f32[4], index: 0, kind: input, shape index: {}]   ;;  %s29_s1 = inlined_call_operand.vmem [shape: f32[16,4], index: 1, kind: output, shape index: {}]  }
   0x1   :  { %v4_v0 = vld [vmem:[%s28_s0] ss:$0 sm:$0xff] }
   0x2   :  { %5 = vst [vmem:[%s29_s1] sm:$0xff] %v4_v0 }
   0x3   :  { %8 = vst [vmem:[%s29_s1 + $0x8] sm:$0xff] %v4_v0 }

// kernel: tile.24
= control target key start
LH: loop header
LB: loop body
LE: loop exit
PB: predicated region body
PF: predicated region fallthrough
CT: control target
= control target key end

     0   :  { %s131_s10 = smov 60   ;;  %s132_s11 = smov 52   ;;  %vm3_vm0 = vcmask 31744   ;;  %vm9_vm1 = vcmask 523744   ;;  %vm15_vm2 = vcmask 490944   ;;  %vm21_vm3 = vcmask 458144   ;;  %s207_s0 = inlined_call_operand.vmem [shape: f32[16,4], index: 0, kind: input, shape index: {}]   ;;  %s208_s1 = inlined_call_operand.vmem [shape: f32[1,64], index: 1, kind: output, shape index: {}]  }
   0x1   :  { %v101_v0 = vld [vmem:[%s207_s0 + $0xf] sm:$0x1]   ;;  %v103_v1 = vld [vmem:[%s207_s0 + $0xd] sm:$0x1]   ;;  %v105_v2 = vld [vmem:[%s207_s0 + $0xb] sm:$0x1]  }
   0x2   :  { %7 = vrot.lane.b32.xlu0 %v101_v0, %s131_s10  ;;  %19 = vrot.lane.b32.xlu1 %v103_v1, %s132_s11  ;;  %s133_s14 = smov 44   ;;  %v102_v3 = vld [vmem:[%s207_s0 + $0xe] sm:$0x1]   ;;  %v104_v4 = vld [vmem:[%s207_s0 + $0xc] sm:$0x1]   ;;  %s134_s19 = smov 56  }
   0x3   :  { %31 = vrot.lane.b32.xlu2 %v105_v2, %s133_s14  ;;  %s135_s20 = smov 48   ;;  %v106_v5 = vld [vmem:[%s207_s0 + $0xa] sm:$0x1]   ;;  %s136_s23 = smov 40   ;;  %v107_v6 = vld [vmem:[%s207_s0 + $0x9] sm:$0x1]  }
   0x4   :  { %v108_v7 = vld [vmem:[%s207_s0 + $0x8] sm:$0x1]   ;;  %s137_s28 = smov 36   ;;  %s138_s29 = smov 32   ;;  %v109_v8 = vld [vmem:[%s207_s0 + $0x7] sm:$0x1]  }
   0x5   :  { %s139_s3 = smov 28   ;;  %v110_v9 = vld [vmem:[%s207_s0 + $0x6] sm:$0x1]   ;;  %v111_v10 = vld [vmem:[%s207_s0 + $0x5] sm:$0x1]   ;;  %s140_s8 = smov 24  }
   0x6   :  { %s141_s9 = smov 20   ;;  %v112_v11 = vld [vmem:[%s207_s0 + $0x4] sm:$0x1]   ;;  %s142_s12 = smov 16   ;;  %v113_v12 = vld [vmem:[%s207_s0 + $0x3] sm:$0x1]  }
   0x7   :  { %v114_v13 = vld [vmem:[%s207_s0 + $0x2] sm:$0x1]   ;;  %s143_s17 = smov 12   ;;  %s144_s18 = smov 8   ;;  %v115_v14 = vld [vmem:[%s207_s0 + $0x1] sm:$0x1]  }
   0x8   :  { %s145_s21 = smov 4   ;;  %v2_v15 = vld [vmem:[%s207_s0] sm:$0x1]   ;;  %vm27_vm4 = vcmask 425344   ;;  %vm33_vm5 = vcmask 392544   ;;  %vm39_vm6 = vcmask 359744  }
   0x9   :  { %4 = vst.msk [vmem:[#allocation0] sm:$0x1] %vm3_vm0, %v2_v15   ;;  %vm45_vm7 = vcmask 326944   ;;  %vm51_vm8 = vcmask 294144   ;;  %vm57_vm9 = vcmask 261344   ;;  %vm63_vm10 = vcmask 228544  }
   0xa   :  { %13 = vrot.lane.b32.xlu0 %v102_v3, %s134_s19  ;;  %25 = vrot.lane.b32.xlu1 %v104_v4, %s135_s20  ;;  %vm69_vm11 = vcmask 195744   ;;  %vm75_vm12 = vcmask 162944   ;;  %vm81_vm13 = vcmask 130144   ;;  %vm87_vm14 = vcmask 97344  }
   0xb   :  { %37 = vrot.lane.b32.xlu2 %v106_v5, %s136_s23  ;;  %vm93_vm15 = vcmask 64544  }
  0x12   :  { %43 = vrot.lane.b32.xlu0 %v107_v6, %s137_s28  ;;  %49 = vrot.lane.b32.xlu1 %v108_v7, %s138_s29 }
  0x13   :  { %55 = vrot.lane.b32.xlu2 %v109_v8, %s139_s3 }
  0x1a   :  { %61 = vrot.lane.b32.xlu0 %v110_v9, %s140_s8  ;;  %67 = vrot.lane.b32.xlu1 %v111_v10, %s141_s9 }
  0x1b   :  { %73 = vrot.lane.b32.xlu2 %v112_v11, %s142_s12 }
  0x22   :  { %79 = vrot.lane.b32.xlu0 %v113_v12, %s143_s17  ;;  %85 = vrot.lane.b32.xlu1 %v114_v13, %s144_s18 }
  0x23   :  { %91 = vrot.lane.b32.xlu2 %v115_v14, %s145_s21 }
  0x5d   :  { %v32_v16 = vpop.permute.xlu2 %31  }
  0x65   :  { %v38_v17 = vpop.permute.xlu2 %37  }
  0x6d   :  { %v56_v18 = vpop.permute.xlu2 %55  }
  0x74   :  { %v8_v19 = vpop.permute.xlu0 %7   ;;  %v20_v20 = vpop.permute.xlu1 %19  }
  0x75   :  { %10 = vst.msk [vmem:[#allocation0] sm:$0x1] %vm9_vm1, %v8_v19   ;;  %v74_v21 = vpop.permute.xlu2 %73  }
  0x7c   :  { %v14_v22 = vpop.permute.xlu0 %13   ;;  %v26_v23 = vpop.permute.xlu1 %25  }
  0x7d   :  { %16 = vst.msk [vmem:[#allocation0] sm:$0x1] %vm15_vm2, %v14_v22   ;;  %v92_v24 = vpop.permute.xlu2 %91  }
  0x7e   :  { %22 = vst.msk [vmem:[#allocation0] sm:$0x1] %vm21_vm3, %v20_v20  }
  0x7f   :  { %28 = vst.msk [vmem:[#allocation0] sm:$0x1] %vm27_vm4, %v26_v23  }
  0x80   :  { %34 = vst.msk [vmem:[#allocation0] sm:$0x1] %vm33_vm5, %v32_v16  }
  0x81   :  { %40 = vst.msk [vmem:[#allocation0] sm:$0x1] %vm39_vm6, %v38_v17  }
  0x84   :  { %v44_v25 = vpop.permute.xlu0 %43   ;;  %v50_v26 = vpop.permute.xlu1 %49  }
  0x85   :  { %46 = vst.msk [vmem:[#allocation0] sm:$0x1] %vm45_vm7, %v44_v25  }
  0x86   :  { %52 = vst.msk [vmem:[#allocation0] sm:$0x1] %vm51_vm8, %v50_v26  }
  0x87   :  { %58 = vst.msk [vmem:[#allocation0] sm:$0x1] %vm57_vm9, %v56_v18  }
  0x8c   :  { %v62_v27 = vpop.permute.xlu0 %61   ;;  %v68_v28 = vpop.permute.xlu1 %67  }
  0x8d   :  { %64 = vst.msk [vmem:[#allocation0] sm:$0x1] %vm63_vm10, %v62_v27  }
  0x8e   :  { %70 = vst.msk [vmem:[#allocation0] sm:$0x1] %vm69_vm11, %v68_v28  }
  0x8f   :  { %76 = vst.msk [vmem:[#allocation0] sm:$0x1] %vm75_vm12, %v74_v21  }
  0x94   :  { %v80_v29 = vpop.permute.xlu0 %79   ;;  %v86_v30 = vpop.permute.xlu1 %85  }
  0x95   :  { %82 = vst.msk [vmem:[#allocation0] sm:$0x1] %vm81_vm13, %v80_v29  }
  0x96   :  { %88 = vst.msk [vmem:[#allocation0] sm:$0x1] %vm87_vm14, %v86_v30  }
  0x97   :  { %94 = vst.msk [vmem:[#allocation0] sm:$0x1] %vm93_vm15, %v92_v24  }
  0x9e   :  { %v97_v31 = vld [vmem:[#allocation0] sm:$0x1] }
  0x9f   :  { %100 = vst [vmem:[%s208_s1] sm:$0x1] %v97_v31 }

// kernel: tile.28
= control target key start
LH: loop header
LB: loop body
LE: loop exit
PB: predicated region body
PF: predicated region fallthrough
CT: control target
= control target key end

     0   :  { %s22_s0 = inlined_call_operand.vmem [shape: f32[8], index: 0, kind: input, shape index: {}]   ;;  %s23_s1 = inlined_call_operand.vmem [shape: f32[8,8], index: 1, kind: output, shape index: {}]  }
   0x1   :  { %v4_v0 = vld [vmem:[%s22_s0] ss:$0 sm:$0xff] }
   0x2   :  { %5 = vst [vmem:[%s23_s1] sm:$0xff] %v4_v0 }

// kernel: tile.29
= control target key start
LH: loop header
LB: loop body
LE: loop exit
PB: predicated region body
PF: predicated region fallthrough
CT: control target
= control target key end

     0   :  { %s67_s10 = smov 56   ;;  %s68_s11 = smov 40   ;;  %vm3_vm0 = vcmask 64512   ;;  %vm9_vm1 = vcmask 523712   ;;  %vm15_vm2 = vcmask 458112   ;;  %vm21_vm3 = vcmask 392512   ;;  %s111_s0 = inlined_call_operand.vmem [shape: f32[8,8], index: 0, kind: input, shape index: {}]   ;;  %s112_s1 = inlined_call_operand.vmem [shape: f32[1,64], index: 1, kind: output, shape index: {}]  }
   0x1   :  { %v53_v0 = vld [vmem:[%s111_s0 + $0x7] sm:$0x1]   ;;  %v55_v1 = vld [vmem:[%s111_s0 + $0x5] sm:$0x1]   ;;  %v57_v2 = vld [vmem:[%s111_s0 + $0x3] sm:$0x1]  }
   0x2   :  { %7 = vrot.lane.b32.xlu0 %v53_v0, %s67_s10  ;;  %19 = vrot.lane.b32.xlu1 %v55_v1, %s68_s11  ;;  %s69_s14 = smov 24   ;;  %v54_v3 = vld [vmem:[%s111_s0 + $0x6] sm:$0x1]   ;;  %v56_v4 = vld [vmem:[%s111_s0 + $0x4] sm:$0x1]   ;;  %s70_s21 = smov 48  }
   0x3   :  { %31 = vrot.lane.b32.xlu2 %v57_v2, %s69_s14  ;;  %v58_v5 = vld [vmem:[%s111_s0 + $0x2] sm:$0x1]   ;;  %s71_s22 = smov 32   ;;  %s72_s23 = smov 16   ;;  %v59_v6 = vld [vmem:[%s111_s0 + $0x1] sm:$0x1]  }
   0x4   :  { %s73_s26 = smov 8   ;;  %v2_v7 = vld [vmem:[%s111_s0] sm:$0x1]   ;;  %vm27_vm4 = vcmask 326912   ;;  %vm33_vm5 = vcmask 261312   ;;  %vm39_vm6 = vcmask 195712  }
   0x5   :  { %4 = vst.msk [vmem:[#allocation0] sm:$0x1] %vm3_vm0, %v2_v7   ;;  %vm45_vm7 = vcmask 130112  }
   0xa   :  { %13 = vrot.lane.b32.xlu0 %v54_v3, %s70_s21  ;;  %25 = vrot.lane.b32.xlu1 %v56_v4, %s71_s22 }
   0xb   :  { %37 = vrot.lane.b32.xlu2 %v58_v5, %s72_s23 }
  0x12   :  { %43 = vrot.lane.b32.xlu0 %v59_v6, %s73_s26 }
  0x5d   :  { %v32_v8 = vpop.permute.xlu2 %31  }
  0x65   :  { %v38_v9 = vpop.permute.xlu2 %37  }
  0x74   :  { %v8_v10 = vpop.permute.xlu0 %7   ;;  %v20_v11 = vpop.permute.xlu1 %19  }
  0x75   :  { %10 = vst.msk [vmem:[#allocation0] sm:$0x1] %vm9_vm1, %v8_v10  }
  0x7c   :  { %v14_v12 = vpop.permute.xlu0 %13   ;;  %v26_v13 = vpop.permute.xlu1 %25  }
  0x7d   :  { %16 = vst.msk [vmem:[#allocation0] sm:$0x1] %vm15_vm2, %v14_v12  }
  0x7e   :  { %22 = vst.msk [vmem:[#allocation0] sm:$0x1] %vm21_vm3, %v20_v11  }
  0x7f   :  { %28 = vst.msk [vmem:[#allocation0] sm:$0x1] %vm27_vm4, %v26_v13  }
  0x80   :  { %34 = vst.msk [vmem:[#allocation0] sm:$0x1] %vm33_vm5, %v32_v8  }
  0x81   :  { %40 = vst.msk [vmem:[#allocation0] sm:$0x1] %vm39_vm6, %v38_v9  }
  0x84   :  { %v44_v14 = vpop.permute.xlu0 %43  }
  0x85   :  { %46 = vst.msk [vmem:[#allocation0] sm:$0x1] %vm45_vm7, %v44_v14  }
  0x8c   :  { %v49_v15 = vld [vmem:[#allocation0] sm:$0x1] }
  0x8d   :  { %52 = vst [vmem:[%s112_s1] sm:$0x1] %v49_v15 }

// kernel: tile.33
= control target key start
LH: loop header
LB: loop body
LE: loop exit
PB: predicated region body
PF: predicated region fallthrough
CT: control target
= control target key end

     0   :  { %s22_s0 = inlined_call_operand.vmem [shape: f32[16], index: 0, kind: input, shape index: {}]   ;;  %s23_s1 = inlined_call_operand.vmem [shape: f32[4,16], index: 1, kind: output, shape index: {}]  }
   0x1   :  { %v4_v0 = vld [vmem:[%s22_s0] ss:$0 sm:$0xff] }
   0x2   :  { %5 = vst [vmem:[%s23_s1] sm:$0xf] %v4_v0 }

// kernel: tile.34
= control target key start
LH: loop header
LB: loop body
LE: loop exit
PB: predicated region body
PF: predicated region fallthrough
CT: control target
= control target key end

     0   :  { %s37_s8 = smov 16   ;;  %s38_s9 = smov 32   ;;  %vm7_vm0 = vcmask 130048   ;;  %vm13_vm1 = vcmask 523648   ;;  %vm19_vm2 = vcmask 392448   ;;  %vm25_vm3 = vcmask 261248   ;;  %s55_s0 = inlined_call_operand.vmem [shape: f32[4,16], index: 0, kind: input, shape index: {}]   ;;  %s56_s1 = inlined_call_operand.vmem [shape: f32[1,64], index: 1, kind: output, shape index: {}]  }
   0x1   :  { %v4_v0 = vld [vmem:[%s55_s0] sm:$0xf]  ;;  %s36_s0 = smov 48  }
   0x2   :  { %5 = vst [vmem:[#allocation1] sm:$0xf] %v4_v0 }
   0x9   :  { %v10_v1 = vld [vmem:[#allocation1 + $0x3] sm:$0x1]   ;;  %v22_v2 = vld [vmem:[#allocation1 + $0x1] sm:$0x1]   ;;  %v16_v3 = vld [vmem:[#allocation1 + $0x2] sm:$0x1]  }
   0xa   :  { %11 = vrot.lane.b32.xlu0 %v10_v1, %s36_s0  ;;  %23 = vrot.lane.b32.xlu1 %v22_v2, %s37_s8  ;;  %v6_v4 = vld [vmem:[#allocation1] sm:$0x1]  }
   0xb   :  { %8 = vst.msk [vmem:[#allocation0] sm:$0x1] %vm7_vm0, %v6_v4  }
  0x12   :  { %17 = vrot.lane.b32.xlu0 %v16_v3, %s38_s9 }
  0x7c   :  { %v12_v5 = vpop.permute.xlu0 %11   ;;  %v24_v6 = vpop.permute.xlu1 %23  }
  0x7d   :  { %14 = vst.msk [vmem:[#allocation0] sm:$0x1] %vm13_vm1, %v12_v5  }
  0x84   :  { %v18_v7 = vpop.permute.xlu0 %17  }
  0x85   :  { %20 = vst.msk [vmem:[#allocation0] sm:$0x1] %vm19_vm2, %v18_v7  }
  0x86   :  { %26 = vst.msk [vmem:[#allocation0] sm:$0x1] %vm25_vm3, %v24_v6  }
  0x8d   :  { %v29_v8 = vld [vmem:[#allocation0] sm:$0x1] }
  0x8e   :  { %32 = vst [vmem:[%s56_s1] sm:$0x1] %v29_v8 }

// kernel: tile.38
= control target key start
LH: loop header
LB: loop body
LE: loop exit
PB: predicated region body
PF: predicated region fallthrough
CT: control target
= control target key end

     0   :  { %s22_s0 = inlined_call_operand.vmem [shape: f32[32], index: 0, kind: input, shape index: {}]   ;;  %s23_s1 = inlined_call_operand.vmem [shape: f32[2,32], index: 1, kind: output, shape index: {}]  }
   0x1   :  { %v4_v0 = vld [vmem:[%s22_s0] ss:$0 sm:$0xff] }
   0x2   :  { %5 = vst [vmem:[%s23_s1] sm:$0x3] %v4_v0 }

// kernel: tile.39
= control target key start
LH: loop header
LB: loop body
LE: loop exit
PB: predicated region body
PF: predicated region fallthrough
CT: control target
= control target key end

     0   :  { %vm7_vm0 = vcmask 261120   ;;  %vm13_vm1 = vcmask 523520   ;;  %s39_s0 = inlined_call_operand.vmem [shape: f32[2,32], index: 0, kind: input, shape index: {}]   ;;  %s40_s1 = inlined_call_operand.vmem [shape: f32[1,64], index: 1, kind: output, shape index: {}]  }
   0x1   :  { %v4_v0 = vld [vmem:[%s39_s0] sm:$0x3]  ;;  %s22_s0 = smov 32  }
   0x2   :  { %5 = vst [vmem:[#allocation1] sm:$0x3] %v4_v0 }
   0x9   :  { %v10_v1 = vld [vmem:[#allocation1 + $0x1] sm:$0x1]   ;;  %v6_v2 = vld [vmem:[#allocation1] sm:$0x1]  }
   0xa   :  { %11 = vrot.lane.b32.xlu0 %v10_v1, %s22_s0  ;;  %8 = vst.msk [vmem:[#allocation0] sm:$0x1] %vm7_vm0, %v6_v2  }
  0x7c   :  { %v12_v3 = vpop.permute.xlu0 %11  }
  0x7d   :  { %14 = vst.msk [vmem:[#allocation0] sm:$0x1] %vm13_vm1, %v12_v3  }
  0x84   :  { %v17_v4 = vld [vmem:[#allocation0] sm:$0x1] }
  0x85   :  { %20 = vst [vmem:[%s40_s1] sm:$0x1] %v17_v4 }

// kernel: cnn_regression_forward.1
= control target key start
LH: loop header
LB: loop body
LE: loop exit
PB: predicated region body
PF: predicated region fallthrough
CT: control target
= control target key end

     0   :  { %s1899_s0 = inlined_call_operand.vmem [shape: f32[64,64], index: 0, kind: input, shape index: {}]   ;;  %s1900_s1 = inlined_call_operand.vmem [shape: f32[3,64,64], index: 1, kind: input, shape index: {}]   ;;  %s1901_s2 = inlined_call_operand.vmem [shape: f32[1,64], index: 2, kind: input, shape index: {}]   ;;  %s1902_s3 = inlined_call_operand.vmem [shape: f32[31,1], index: 3, kind: input, shape index: {}]   ;;  %s1903_s4 = inlined_call_operand.vmem [shape: f32[3,64,64], index: 4, kind: input, shape index: {}]   ;;  %s1904_s5 = inlined_call_operand.vmem [shape: f32[1,64], index: 5, kind: input, shape index: {}]   ;;  %s1905_s6 = inlined_call_operand.vmem [shape: f32[15,1], index: 6, kind: input, shape index: {}]   ;;  %s1906_s7 = inlined_call_operand.vmem [shape: f32[3,64,64], index: 7, kind: input, shape index: {}]   ;;  %s1907_s8 = inlined_call_operand.vmem [shape: f32[1,64], index: 8, kind: input, shape index: {}]   ;;  %s1908_s9 = inlined_call_operand.vmem [shape: f32[7,1], index: 9, kind: input, shape index: {}]   ;;  %s1909_s10 = inlined_call_operand.vmem [shape: f32[3,64,64], index: 10, kind: input, shape index: {}]   ;;  %s1910_s11 = inlined_call_operand.vmem [shape: f32[1,64], index: 11, kind: input, shape index: {}]   ;;  %s1911_s12 = inlined_call_operand.vmem [shape: f32[3,1], index: 12, kind: input, shape index: {}]   ;;  %s1912_s13 = inlined_call_operand.vmem [shape: f32[1,64,128], index: 13, kind: input, shape index: {}]   ;;  %s1913_s14 = inlined_call_operand.vmem [shape: f32[1,128], index: 14, kind: input, shape index: {}]   ;;  %s1914_s15 = inlined_call_operand.vmem [shape: f32[128,2], index: 15, kind: input, shape index: {}]   ;;  %s1915_s16 = inlined_call_operand.vmem [shape: f32[1,2], index: 16, kind: input, shape index: {}]   ;;  %s1916_s17 = inlined_call_operand.hbm [shape: f32[2,2], index: 17, kind: output, shape index: {}]  }
   0x1   :  { %1919 = sst [smem:[#allocation13_spill]] %s1899_s0 }
   0x2   :  { %1920 = sst [smem:[#allocation14_spill]] %s1900_s1 }
   0x3   :  { %s1921_s26 = sld [smem:[#allocation14_spill]]  ;;  %vm90_vm0 = vcmask 523264  }
   0x4   :  { %s1922_s30 = sld [smem:[#allocation13_spill]] }
   0x9   :  { %v1043_v0 = vld [vmem:[%s1921_s26 + $0x78] sm:$0xff]  ;;  %v1042_v2 = vld [vmem:[%s1921_s26 + $0x70] sm:$0xff]  ;;  %v1041_v4 = vld [vmem:[%s1921_s26 + $0x68] sm:$0xff] }
   0xa   :  { %v72_v1 = vld [vmem:[%s1921_s26 + $0x38] sm:$0xff]  ;;  %123 = vmatpush.msra.mxu0 %v1043_v0  ;;  %v71_v3 = vld [vmem:[%s1921_s26 + $0x30] sm:$0xff]  ;;  %v70_v5 = vld [vmem:[%s1921_s26 + $0x28] sm:$0xff] }
   0xb   :  { %1146 = vmatpush.msra.mxu2 %v72_v1  ;;  %188 = vmatpush.msra.mxu1 %v72_v1  ;;  %v1040_v6 = vld [vmem:[%s1921_s26 + $0x60] sm:$0xff]  ;;  %v1039_v8 = vld [vmem:[%s1921_s26 + $0x58] sm:$0xff]  ;;  %v1038_v10 = vld [vmem:[%s1921_s26 + $0x50] sm:$0xff] }
   0xc   :  { %124 = vmatpush.msra.mxu0 %v1042_v2  ;;  %v69_v7 = vld [vmem:[%s1921_s26 + $0x20] sm:$0xff]  ;;  %v68_v9 = vld [vmem:[%s1921_s26 + $0x18] sm:$0xff]  ;;  %v67_v11 = vld [vmem:[%s1921_s26 + $0x10] sm:$0xff] }
   0xd   :  { %1147 = vmatpush.msra.mxu2 %v71_v3  ;;  %189 = vmatpush.msra.mxu1 %v71_v3  ;;  %v1037_v12 = vld [vmem:[%s1921_s26 + $0x48] sm:$0xff]  ;;  %v1036_v14 = vld [vmem:[%s1921_s26 + $0x40] sm:$0xff]  ;;  %v63_v17 = vld [vmem:[%s1922_s30 + $0x30] sm:$0xff] }
   0xe   :  { %125 = vmatpush.msra.mxu0 %v1041_v4  ;;  %v66_v13 = vld [vmem:[%s1921_s26 + $0x8] sm:$0xff]  ;;  %v65_v15 = vld [vmem:[%s1921_s26] sm:$0xff] }
   0xf   :  { %1148 = vmatpush.msra.mxu2 %v70_v5  ;;  %190 = vmatpush.msra.mxu1 %v70_v5  ;;  %v73_v16 = vld [vmem:[%s1922_s30 + $0x1] sm:$0xff] }
  0x10   :  { %126 = vmatpush.msra.mxu0 %v1040_v6 }
  0x11   :  { %1149 = vmatpush.msra.mxu2 %v69_v7  ;;  %191 = vmatpush.msra.mxu1 %v69_v7 }
  0x12   :  { %127 = vmatpush.msra.mxu0 %v1039_v8 }
  0x13   :  { %1150 = vmatpush.msra.mxu2 %v68_v9  ;;  %192 = vmatpush.msra.mxu1 %v68_v9 }
  0x14   :  { %128 = vmatpush.msra.mxu0 %v1038_v10 }
  0x15   :  { %1151 = vmatpush.msra.mxu2 %v67_v11  ;;  %193 = vmatpush.msra.mxu1 %v67_v11 }
  0x16   :  { %129 = vmatpush.msra.mxu0 %v1037_v12 }
  0x17   :  { %1152 = vmatpush.msra.mxu2 %v66_v13 }
  0x18   :  { %22 = vsyncpa [#allocation11], 0  ;;  %v1067_v18 = vld [vmem:[%s1921_s26 + $0xb8] sm:$0xff]  ;;  %194 = vmatpush.msra.mxu1 %v66_v13  ;;  %130 = vmatpush.msra.mxu0 %v1036_v14  ;;  %v57_v19 = vld [vmem:[%s1922_s30] sm:$0xff]  ;;  %v1200_v9 = vmov 0   ;;  %s1201_s27 = smov 60  }
  0x19   :  { %1153 = vmatpush.msra.mxu2 %v65_v15  ;;  %1044 = vmatmul.msk.f32.vlgmr.msra.gmra.mxu0 %vm90_vm0, %v73_v16  ;;  %v1066_v20 = vld [vmem:[%s1921_s26 + $0xb0] sm:$0xff]  ;;  %v1065_v21 = vld [vmem:[%s1921_s26 + $0xa8] sm:$0xff]  ;;  %v1064_v22 = vld [vmem:[%s1921_s26 + $0xa0] sm:$0xff]  ;;  %s1202_s28 = smov 124   ;;  %vm338_vm1 = vcmask 521216   ;;  %vm387_vm2 = vcmask 490496  }
  0x1a   :  { %1058 = vmatmul.msk.f32.vlgmr.msra.gmra.mxu2 %vm90_vm0, %v63_v17  ;;  %195 = vmatpush.msra.mxu1 %v65_v15  ;;  %v74_v23 = vld [vmem:[%s1922_s30 + $0x9] sm:$0xff]  ;;  %v64_v24 = vld [vmem:[%s1922_s30 + $0x38] sm:$0x3f]  ;;  %v1060_v29 = vld [vmem:[%s1921_s26 + $0x80] sm:$0xff]  ;;  %vm429_vm3 = vcmask 516096   ;;  %vm427_vm4 = vcmask 522240  }
  0x1b   :  { %270 = vmatpush.msrb.mxu2 %v1067_v18  ;;  %1052 = vmatmul.msk.f32.vlgmr.msra.gmra.mxu1 %vm90_vm0, %v57_v19  ;;  %v1063_v25 = vld [vmem:[%s1921_s26 + $0x98] sm:$0xff]  ;;  %v58_v26 = vld [vmem:[%s1922_s30 + $0x8] sm:$0xff]  ;;  %v1062_v27 = vld [vmem:[%s1921_s26 + $0x90] sm:$0xff]  ;;  %s1205_s1 = smov 120   ;;  %vm635_vm5 = vcmask 457728   ;;  %vm799_vm6 = vcmask 392192  }
  0x1c   :  { %v1061_v28 = vld [vmem:[%s1921_s26 + $0x88] sm:$0xff]  ;;  %v75_v30 = vld [vmem:[%s1922_s30 + $0x11] sm:$0xff]  ;;  %v76_v33 = vld [vmem:[%s1922_s30 + $0x19] sm:$0xff]  ;;  %1165 = vset.pattern.permute.xlu2 %v1200_v9  ;;  %1166 = vset.pattern.permute.xlu1 %v1200_v9  ;;  %s1206_s26 = smov 48   ;;  %s1208_s23 = smov 32   ;;  %vm928_vm7 = vcmask 261120  }
  0x1d   :  { %271 = vmatpush.msrb.mxu2 %v1066_v20  ;;  %v221_v31 = vld [vmem:[%s1922_s30 + $0x2] sm:$0xff]  ;;  %v59_v32 = vld [vmem:[%s1922_s30 + $0x10] sm:$0xff]  ;;  %v60_v35 = vld [vmem:[%s1922_s30 + $0x18] sm:$0xff]  ;;  %1167 = vset.pattern.permute.xlu0 %v1200_v9  ;;  %vm938_vm8 = vcmask 518144   ;;  %s1210_s19 = smov [#allocation10]   ;;  %s1027_s22 = sshll.u32 %s1916_s17, 4  ;;  %s1028_s22 = int_to_ptr.hbm [resolvable:$true] %s1027_s22 }
  0x1e   :  { %v222_v34 = vld [vmem:[%s1922_s30 + $0xa] sm:$0xff]  ;;  %v77_v36 = vld [vmem:[%s1922_s30 + $0x21] sm:$0xff]  ;;  %v223_v37 = vld [vmem:[%s1922_s30 + $0x12] sm:$0xff]  ;;  %s1025_s20 = sshll.u32 %s1210_s19, 4  ;;  %vm1018_vm9 = vcmask 9216   ;;  %s1026_s20 = int_to_ptr.vmem [resolvable:$true] %s1025_s20 }
  0x1f   :  { %272 = vmatpush.msrb.mxu2 %v1065_v21  ;;  %v61_v38 = vld [vmem:[%s1922_s30 + $0x20] sm:$0xff]  ;;  %v78_v39 = vld [vmem:[%s1922_s30 + $0x29] sm:$0xff]  ;;  %v79_v42 = vld [vmem:[%s1922_s30 + $0x31] sm:$0xff] }
  0x20   :  { %v224_v40 = vld [vmem:[%s1922_s30 + $0x1a] sm:$0xff]  ;;  %v62_v41 = vld [vmem:[%s1922_s30 + $0x28] sm:$0xff]  ;;  %v227_v46 = vld [vmem:[%s1922_s30 + $0x32] sm:$0xff] }
  0x21   :  { %273 = vmatpush.msrb.mxu2 %v1064_v22  ;;  %1045 = vmatmul.msk.f32.gmra.mxu0 %vm90_vm0, %v74_v23  ;;  %v225_v43 = vld [vmem:[%s1922_s30 + $0x22] sm:$0xff]  ;;  %v80_v44 = vld [vmem:[%s1922_s30 + $0x39] sm:$0x3f]  ;;  %v226_v45 = vld [vmem:[%s1922_s30 + $0x2a] sm:$0xff] }
  0x22   :  { %1059 = vmatmul.msk.f32.gmra.mxu2 %vm90_vm0, %v64_v24  ;;  %v228_v47 = vld [vmem:[%s1922_s30 + $0x3a] sm:$0x3f]  ;;  %v1476_v55 = vld [vmem:[%s1901_s2] ss:$0 sm:$0xff]  ;;  %v397_v21 = vld [vmem:[%s1902_s3 + $0x8] sm:$0xff] }
  0x23   :  { %274 = vmatpush.msrb.mxu2 %v1063_v25  ;;  %1053 = vmatmul.msk.f32.gmra.mxu1 %vm90_vm0, %v58_v26  ;;  %v396_v10 = vld [vmem:[%s1902_s3] sm:$0xff] }
  0x24   :  { %402 = vperm.xlu2 %1165, %v396_v10   ;;  %v1092_v9 = vld [vmem:[%s1903_s4 + $0x80] sm:$0xff] }
  0x25   :  { %275 = vmatpush.msrb.mxu2 %v1062_v27  ;;  %v398_v27 = vld [vmem:[%s1902_s3 + $0x10] sm:$0xff] }
  0x27   :  { %276 = vmatpush.msrb.mxu2 %v1061_v28 }
  0x29   :  { %277 = vmatpush.msrb.mxu2 %v1060_v29  ;;  %1046 = vmatmul.msk.f32.gmra.mxu0 %vm90_vm0, %v75_v30 }
  0x2a   :  { %1068 = vmatmul.msk.f32.vlgmr.msrb.gmra.mxu2 %vm90_vm0, %v221_v31 }
  0x2b   :  { %1054 = vmatmul.msk.f32.gmra.mxu1 %vm90_vm0, %v59_v32 }
  0x2c   :  { %407 = vperm.xlu2 %1165, %v397_v21  }
  0x31   :  { %1047 = vmatmul.msk.f32.gmra.mxu0 %vm90_vm0, %v76_v33 }
  0x32   :  { %1069 = vmatmul.msk.f32.gmra.mxu2 %vm90_vm0, %v222_v34 }
  0x33   :  { %1055 = vmatmul.msk.f32.gmra.mxu1 %vm90_vm0, %v60_v35 }
  0x34   :  { %412 = vperm.xlu2 %1165, %v398_v27  }
  0x39   :  { %1048 = vmatmul.msk.f32.gmra.mxu0 %vm90_vm0, %v77_v36 }
  0x3a   :  { %1070 = vmatmul.msk.f32.gmra.mxu2 %vm90_vm0, %v223_v37  ;;  %v399_v37 = vld [vmem:[%s1902_s3 + $0x18] sm:$0x7f] }
  0x3b   :  { %1056 = vmatmul.msk.f32.gmra.mxu1 %vm90_vm0, %v61_v38 }
  0x3c   :  { %417 = vperm.xlu2 %1165, %v399_v37   ;;  %v436_v37 = vld [vmem:[%s1903_s4 + $0x8] sm:$0xff] }
  0x41   :  { %1049 = vmatmul.msk.f32.gmra.mxu0 %vm90_vm0, %v78_v39 }
  0x42   :  { %1071 = vmatmul.msk.f32.gmra.mxu2 %vm90_vm0, %v224_v40 }
  0x43   :  { %1057 = vmatmul.msk.f32.gmra.mxu1 %vm90_vm0, %v62_v41 }
  0x49   :  { %1050 = vmatmul.msk.f32.gmra.mxu0 %vm90_vm0, %v79_v42 }
  0x4a   :  { %1072 = vmatmul.msk.f32.gmra.mxu2 %vm90_vm0, %v225_v43 }
  0x51   :  { %1051 = vmatmul.msk.f32.gmra.mxu0 %vm90_vm0, %v80_v44 }
  0x52   :  { %1073 = vmatmul.msk.f32.gmra.mxu2 %vm90_vm0, %v226_v45 }
  0x5a   :  { %1074 = vmatmul.msk.f32.gmra.mxu2 %vm90_vm0, %v227_v46 }
  0x62   :  { %1075 = vmatmul.msk.f32.gmra.mxu2 %vm90_vm0, %v228_v47 }
  0x96   :  { %v132_v48 = vpop.f32.mrf.mxu0 }
  0x98   :  { %v197_v50 = vpop.f32.mrf.mxu1 }
  0x99   :  { %v198_v54 = vadd.f32 %v197_v50, %v132_v48 }
  0x9d   :  { %v1469_v49 = vpop.f32.mrf.mxu2 }
  0x9e   :  { %v135_v51 = vpop.f32.mrf.mxu0 }
  0xa0   :  { %v200_v53 = vpop.f32.mrf.mxu1 }
  0xa1   :  { %v201_v62 = vadd.f32 %v200_v53, %v135_v51 }
  0xa5   :  { %v1471_v52 = vpop.f32.mrf.mxu2 }
  0xa6   :  { %v138_v58 = vpop.f32.mrf.mxu0 }
  0xa8   :  { %v203_v60 = vpop.f32.mrf.mxu1 }
  0xa9   :  { %v204_v4 = vadd.f32 %v203_v60, %v138_v58  ;;  %v1082_v60 = vld [vmem:[%s1903_s4 + $0x70] sm:$0xff] }
  0xad   :  { %v279_v56 = vpop.f32.mrf.mxu2 }
  0xae   :  { %v303_v57 = vadd.f32 %v279_v56, %v198_v54  ;;  %v141_v2 = vpop.f32.mrf.mxu0 }
  0xb0   :  { %v315_v59 = vadd.f32 %v1476_v55, %v303_v57  ;;  %v206_v5 = vpop.f32.mrf.mxu1 }
  0xb1   :  { %v207_v12 = vadd.f32 %v206_v5, %v141_v2  ;;  %v1079_v2 = vld [vmem:[%s1903_s4 + $0x58] sm:$0xff]  ;;  %v1094_v5 = vld [vmem:[%s1903_s4 + $0x90] sm:$0xff] }
  0xb2   :  { %v323_v61 = vmax.f32 %v315_v59, 0.0  ;;  %v1083_v59 = vld [vmem:[%s1903_s4 + $0x78] sm:$0xff] }
  0xb3   :  { %476 = vmatpush.msra.mxu3 %v1083_v59 }
  0xb4   :  { %331 = vst.msk [vmem:[#allocation2] sm:$0xff] %vm90_vm0, %v323_v61  ;;  %v1098_v61 = vld [vmem:[%s1903_s4 + $0xb0] sm:$0xff] }
  0xb5   :  { %v282_v63 = vpop.f32.mrf.mxu2  ;;  %477 = vmatpush.msra.mxu3 %v1082_v60 }
  0xb6   :  { %v304_v0 = vadd.f32 %v282_v63, %v201_v62  ;;  %v144_v13 = vpop.f32.mrf.mxu0  ;;  %v1081_v62 = vld [vmem:[%s1903_s4 + $0x68] sm:$0xff] }
  0xb7   :  { %v1097_v63 = vld [vmem:[%s1903_s4 + $0xa8] sm:$0xff]  ;;  %478 = vmatpush.msra.mxu3 %v1081_v62  ;;  %v1169_v62 = vld [vmem:[%s1904_s5] ss:$0 sm:$0xff]  ;;  %s1204_s5 = smov 56  }
  0xb8   :  { %v316_v1 = vadd.f32 %v1476_v55, %v304_v0  ;;  %v209_v18 = vpop.f32.mrf.mxu1  ;;  %v1080_v0 = vld [vmem:[%s1903_s4 + $0x60] sm:$0xff] }
  0xb9   :  { %v210_v23 = vadd.f32 %v209_v18, %v144_v13  ;;  %479 = vmatpush.msra.mxu3 %v1080_v0  ;;  %v403_v13 = vpop.permute.xlu2 %402 }
  0xba   :  { %v324_v3 = vmax.f32 %v316_v1, 0.0  ;;  %v1096_v1 = vld [vmem:[%s1903_s4 + $0xa0] sm:$0xff] }
  0xbb   :  { %480 = vmatpush.msra.mxu3 %v1079_v2 }
  0xbc   :  { %332 = vst.msk [vmem:[#allocation2 + $0x8] sm:$0xff] %vm90_vm0, %v324_v3  ;;  %v1095_v3 = vld [vmem:[%s1903_s4 + $0x98] sm:$0xff] }
  0xbd   :  { %v285_v6 = vpop.f32.mrf.mxu2 }
  0xbe   :  { %v305_v7 = vadd.f32 %v285_v6, %v204_v4  ;;  %v147_v24 = vpop.f32.mrf.mxu0  ;;  %v1078_v4 = vld [vmem:[%s1903_s4 + $0x50] sm:$0xff]  ;;  %v1077_v6 = vld [vmem:[%s1903_s4 + $0x48] sm:$0xff] }
  0xbf   :  { %481 = vmatpush.msra.mxu3 %v1078_v4 }
  0xc0   :  { %v317_v8 = vadd.f32 %v1476_v55, %v305_v7  ;;  %v212_v28 = vpop.f32.mrf.mxu1  ;;  %v1093_v7 = vld [vmem:[%s1903_s4 + $0x88] sm:$0xff] }
  0xc1   :  { %v213_v31 = vadd.f32 %v212_v28, %v147_v24  ;;  %482 = vmatpush.msra.mxu3 %v1077_v6  ;;  %v440_v24 = vld [vmem:[%s1903_s4 + $0x28] sm:$0xff] }
  0xc2   :  { %v325_v11 = vmax.f32 %v317_v8, 0.0  ;;  %v1076_v8 = vld [vmem:[%s1903_s4 + $0x40] sm:$0xff] }
  0xc3   :  { %v340_v14 = vld [vmem:[#allocation2] ss:$2 sm:$0xff]  ;;  %v348_v15 = vld [vmem:[#allocation2 + $0x1] ss:$2 sm:$0xff]  ;;  %483 = vmatpush.msra.mxu3 %v1076_v8 }
  0xc4   :  { %333 = vst.msk [vmem:[#allocation2 + $0x10] sm:$0xff] %vm90_vm0, %v325_v11  ;;  %v1487_v16 = vmax.f32 %v340_v14, %v348_v15 }
  0xc5   :  { %v288_v17 = vpop.f32.mrf.mxu2 }
  0xc6   :  { %v306_v19 = vadd.f32 %v288_v17, %v207_v12  ;;  %375 = vrot.lane.b32.xlu1 %v1487_v16, %s1201_s27  ;;  %363 = vrot.lane.b32.xlu0 %v1487_v16, %s1202_s28  ;;  %v150_v38 = vpop.f32.mrf.mxu0  ;;  %v442_v17 = vld [vmem:[%s1903_s4 + $0x38] sm:$0xff] }
  0xc7   :  { %v216_v41 = vadd.f32 %v1469_v49, %v150_v38  ;;  %517 = vmatpush.msrb.mxu3 %v442_v17  ;;  %v435_v38 = vld [vmem:[%s1903_s4] sm:$0xff] }
  0xc8   :  { %v318_v20 = vadd.f32 %v1476_v55, %v306_v19 }
  0xca   :  { %v326_v22 = vmax.f32 %v318_v20, 0.0 }
  0xcc   :  { %334 = vst.msk [vmem:[#allocation2 + $0x18] sm:$0xff] %vm90_vm0, %v326_v22  ;;  %v408_v22 = vpop.permute.xlu2 %407 }
  0xcd   :  { %v291_v25 = vpop.f32.mrf.mxu2 }
  0xce   :  { %v307_v26 = vadd.f32 %v291_v25, %v210_v23  ;;  %v153_v45 = vpop.f32.mrf.mxu0  ;;  %v1203_v25 = vmov 0.0  }
  0xcf   :  { %v219_v50 = vadd.f32 %v1471_v52, %v153_v45  ;;  %430 = vst.msk [vmem:[#allocation6 + $0x1f] sm:$0x1] %vm429_vm3, %v1203_v25 }
  0xd0   :  { %v319_v29 = vadd.f32 %v1476_v55, %v307_v26  ;;  %v439_v26 = vld [vmem:[%s1903_s4 + $0x20] sm:$0xff]  ;;  %656 = vst.msk [vmem:[#allocation7 + $0xf] sm:$0x1] %vm429_vm3, %v1203_v25 }
  0xd1   :  { %810 = vst.msk [vmem:[#allocation8 + $0x7] sm:$0x1] %vm429_vm3, %v1203_v25  ;;  %v665_v25 = vld [vmem:[%s1906_s7 + $0x30] sm:$0xff] }
  0xd2   :  { %v327_v30 = vmax.f32 %v319_v29, 0.0  ;;  %v438_v29 = vld [vmem:[%s1903_s4 + $0x18] sm:$0xff] }
  0xd3   :  { %v342_v32 = vld [vmem:[#allocation2 + $0x10] ss:$2 sm:$0xff]  ;;  %v350_v33 = vld [vmem:[#allocation2 + $0x11] ss:$2 sm:$0xff] }
  0xd4   :  { %335 = vst.msk [vmem:[#allocation2 + $0x20] sm:$0xff] %vm90_vm0, %v327_v30  ;;  %v1503_v34 = vmax.f32 %v342_v32, %v350_v33  ;;  %v437_v30 = vld [vmem:[%s1903_s4 + $0x10] sm:$0xff] }
  0xd5   :  { %v294_v35 = vpop.f32.mrf.mxu2 }
  0xd6   :  { %v308_v36 = vadd.f32 %v294_v35, %v213_v31  ;;  %377 = vrot.lane.b32.xlu1 %v1503_v34, %s1201_s27  ;;  %365 = vrot.lane.b32.xlu0 %v1503_v34, %s1202_s28  ;;  %v413_v35 = vpop.permute.xlu2 %412 }
  0xd8   :  { %v320_v39 = vadd.f32 %v1476_v55, %v308_v36 }
  0xda   :  { %v328_v40 = vmax.f32 %v320_v39, 0.0 }
  0xdc   :  { %336 = vst.msk [vmem:[#allocation2 + $0x28] sm:$0xff] %vm90_vm0, %v328_v40 }
  0xdd   :  { %v297_v42 = vpop.f32.mrf.mxu2 }
  0xde   :  { %v309_v43 = vadd.f32 %v297_v42, %v216_v41  ;;  %v418_v45 = vpop.permute.xlu2 %417 }
  0xe0   :  { %v321_v44 = vadd.f32 %v1476_v55, %v309_v43 }
  0xe2   :  { %v329_v46 = vmax.f32 %v321_v44, 0.0 }
  0xe3   :  { %v344_v47 = vld [vmem:[#allocation2 + $0x20] ss:$2 sm:$0xff]  ;;  %v352_v48 = vld [vmem:[#allocation2 + $0x21] ss:$2 sm:$0xff] }
  0xe4   :  { %337 = vst.msk [vmem:[#allocation2 + $0x30] sm:$0xff] %vm90_vm0, %v329_v46  ;;  %v1518_v51 = vmax.f32 %v344_v47, %v352_v48 }
  0xe5   :  { %v300_v53 = vpop.f32.mrf.mxu2 }
  0xe6   :  { %v310_v54 = vadd.f32 %v300_v53, %v219_v50  ;;  %379 = vrot.lane.b32.xlu1 %v1518_v51, %s1201_s27  ;;  %367 = vrot.lane.b32.xlu0 %v1518_v51, %s1202_s28 }
  0xe8   :  { %v322_v49 = vadd.f32 %v1476_v55, %v310_v54  ;;  %v1099_v55 = vld [vmem:[%s1903_s4 + $0xb8] sm:$0xff] }
  0xe9   :  { %571 = vmatpush.msrb.mxu0 %v1099_v55 }
  0xea   :  { %v330_v56 = vmax.f32 %v322_v49, 0.0 }
  0xeb   :  { %572 = vmatpush.msrb.mxu0 %v1098_v61 }
  0xec   :  { %339 = vst.msk [vmem:[#allocation2 + $0x38] sm:$0x3f] %vm338_vm1, %v330_v56 }
  0xed   :  { %573 = vmatpush.msrb.mxu0 %v1097_v63 }
  0xef   :  { %574 = vmatpush.msrb.mxu0 %v1096_v1 }
  0xf1   :  { %575 = vmatpush.msrb.mxu0 %v1095_v3 }
  0xf3   :  { %v346_v57 = vld [vmem:[#allocation2 + $0x30] ss:$2 sm:$0x7f]  ;;  %v354_v52 = vld [vmem:[#allocation2 + $0x31] ss:$2 sm:$0x7f]  ;;  %576 = vmatpush.msrb.mxu0 %v1094_v5 }
  0xf4   :  { %v1526_v58 = vmax.f32 %v346_v57, %v354_v52 }
  0xf5   :  { %577 = vmatpush.msrb.mxu0 %v1093_v7 }
  0xf6   :  { %381 = vrot.lane.b32.xlu1 %v1526_v58, %s1201_s27  ;;  %369 = vrot.lane.b32.xlu0 %v1526_v58, %s1202_s28 }
  0xf7   :  { %578 = vmatpush.msrb.mxu0 %v1092_v9 }
 0x138   :  { %v376_v10 = vpop.permute.xlu1 %375  ;;  %v364_v11 = vpop.permute.xlu0 %363 }
 0x139   :  { %v388_v12 = vsel %vm387_vm2, %v364_v11, %v376_v10 }
 0x13a   :  { %v392_v14 = vmax.f32 %v1487_v16, %v388_v12  ;;  %v441_v16 = vld [vmem:[%s1903_s4 + $0x30] sm:$0xff] }
 0x13b   :  { %518 = vmatpush.msrb.mxu3 %v441_v16  ;;  %v640_v16 = vld [vmem:[%s1905_s6] sm:$0xff] }
 0x13c   :  { %v420_v15 = vmul.f32 %v403_v13, %v392_v14 }
 0x13d   :  { %519 = vmatpush.msrb.mxu3 %v440_v24  ;;  %v666_v24 = vld [vmem:[%s1906_s7 + $0x38] sm:$0xff] }
 0x13e   :  { %424 = vst.msk [vmem:[#allocation6] sm:$0xff] %vm90_vm0, %v420_v15  ;;  %721 = vmatpush.msra.mxu2 %v666_v24 }
 0x13f   :  { %520 = vmatpush.msrb.mxu3 %v439_v26  ;;  %v1111_v26 = vld [vmem:[%s1906_s7 + $0x78] sm:$0xff] }
 0x140   :  { %692 = vmatpush.msrb.mxu1 %v1111_v26  ;;  %722 = vmatpush.msra.mxu2 %v665_v25 }
 0x141   :  { %521 = vmatpush.msrb.mxu3 %v438_v29  ;;  %v663_v29 = vld [vmem:[%s1906_s7 + $0x20] sm:$0xff] }
 0x143   :  { %522 = vmatpush.msrb.mxu3 %v437_v30 }
 0x145   :  { %523 = vmatpush.msrb.mxu3 %v436_v37  ;;  %v431_v53 = vld [vmem:[#allocation6] sm:$0xff]  ;;  %v1109_v37 = vld [vmem:[%s1906_s7 + $0x68] sm:$0xff] }
 0x147   :  { %524 = vmatpush.msrb.mxu3 %v435_v38  ;;  %v1123_v38 = vld [vmem:[%s1906_s7 + $0xb8] sm:$0xff] }
 0x148   :  { %v378_v18 = vpop.permute.xlu1 %377  ;;  %v366_v19 = vpop.permute.xlu0 %365 }
 0x149   :  { %v389_v20 = vsel %vm387_vm2, %v366_v19, %v378_v18 }
 0x14a   :  { %v393_v21 = vmax.f32 %v1503_v34, %v389_v20 }
 0x14c   :  { %v421_v23 = vmul.f32 %v408_v22, %v393_v21 }
 0x14e   :  { %425 = vst.msk [vmem:[#allocation6 + $0x8] sm:$0xff] %vm90_vm0, %v421_v23 }
 0x155   :  { %v443_v27 = vld [vmem:[#allocation6 + $0x1] sm:$0xff] }
 0x156   :  { %v538_v28 = vld [vmem:[#allocation6 + $0x2] sm:$0xff]  ;;  %1084 = vmatmul.msk.f32.vlgmr.msra.gmra.mxu3 %vm90_vm0, %v443_v27  ;;  %v1110_v27 = vld [vmem:[%s1906_s7 + $0x70] sm:$0xff] }
 0x157   :  { %1100 = vmatmul.msk.f32.vlgmr.msrb.gmra.mxu0 %vm90_vm0, %v538_v28  ;;  %v432_v54 = vld [vmem:[#allocation6 + $0x8] sm:$0xff]  ;;  %v664_v28 = vld [vmem:[%s1906_s7 + $0x28] sm:$0xff]  ;;  %693 = vmatpush.msrb.mxu1 %v1110_v27 }
 0x158   :  { %v380_v31 = vpop.permute.xlu1 %379  ;;  %v368_v32 = vpop.permute.xlu0 %367  ;;  %723 = vmatpush.msra.mxu2 %v664_v28  ;;  %761 = vmatpush.msra.mxu3 %v1123_v38  ;;  %v815_v38 = vld [vmem:[%s1909_s10 + $0x18] sm:$0xff] }
 0x159   :  { %v390_v33 = vsel %vm387_vm2, %v368_v32, %v380_v31  ;;  %694 = vmatpush.msrb.mxu1 %v1109_v37  ;;  %v1140_v37 = vld [vmem:[%s1909_s10 + $0xa0] sm:$0xff] }
 0x15a   :  { %v394_v34 = vmax.f32 %v1518_v51, %v390_v33  ;;  %724 = vmatpush.msra.mxu2 %v663_v29  ;;  %v641_v33 = vld [vmem:[%s1905_s6 + $0x8] sm:$0x7f] }
 0x15c   :  { %v422_v36 = vmul.f32 %v413_v35, %v394_v34  ;;  %v802_v34 = vld [vmem:[%s1908_s9] sm:$0x7f]  ;;  %s1209_s9 = smov 96  }
 0x15d   :  { %v931_v35 = vld [vmem:[%s1911_s12] sm:$0x7] }
 0x15e   :  { %426 = vst.msk [vmem:[#allocation6 + $0x10] sm:$0xff] %vm90_vm0, %v422_v36  ;;  %v662_v36 = vld [vmem:[%s1906_s7 + $0x18] sm:$0xff] }
 0x15f   :  { %725 = vmatpush.msra.mxu2 %v662_v36  ;;  %v1130_v36 = vld [vmem:[%s1909_s10 + $0x60] sm:$0xff] }
 0x165   :  { %v444_v39 = vld [vmem:[#allocation6 + $0x9] sm:$0xff] }
 0x166   :  { %v539_v40 = vld [vmem:[#allocation6 + $0xa] sm:$0xff]  ;;  %1085 = vmatmul.msk.f32.gmra.mxu3 %vm90_vm0, %v444_v39  ;;  %v1122_v39 = vld [vmem:[%s1906_s7 + $0xb0] sm:$0xff] }
 0x167   :  { %1101 = vmatmul.msk.f32.gmra.mxu0 %vm90_vm0, %v539_v40  ;;  %v433_v49 = vld [vmem:[#allocation6 + $0x10] sm:$0xff]  ;;  %v1108_v40 = vld [vmem:[%s1906_s7 + $0x60] sm:$0xff]  ;;  %762 = vmatpush.msra.mxu3 %v1122_v39  ;;  %v1129_v39 = vld [vmem:[%s1909_s10 + $0x58] sm:$0xff] }
 0x168   :  { %v382_v41 = vpop.permute.xlu1 %381  ;;  %v370_v42 = vpop.permute.xlu0 %369  ;;  %695 = vmatpush.msrb.mxu1 %v1108_v40  ;;  %v1139_v40 = vld [vmem:[%s1909_s10 + $0x98] sm:$0xff] }
 0x169   :  { %v391_v43 = vsel %vm387_vm2, %v370_v42, %v382_v41  ;;  %v661_v41 = vld [vmem:[%s1906_s7 + $0x10] sm:$0xff]  ;;  %v1121_v42 = vld [vmem:[%s1906_s7 + $0xa8] sm:$0xff] }
 0x16a   :  { %v395_v44 = vmax.f32 %v1526_v58, %v391_v43  ;;  %726 = vmatpush.msra.mxu2 %v661_v41  ;;  %763 = vmatpush.msra.mxu3 %v1121_v42  ;;  %v1107_v43 = vld [vmem:[%s1906_s7 + $0x58] sm:$0xff]  ;;  %v814_v41 = vld [vmem:[%s1909_s10 + $0x10] sm:$0xff] }
 0x16b   :  { %696 = vmatpush.msrb.mxu1 %v1107_v43  ;;  %v1128_v42 = vld [vmem:[%s1909_s10 + $0x50] sm:$0xff] }
 0x16c   :  { %v423_v46 = vmul.f32 %v418_v45, %v395_v44  ;;  %v1120_v44 = vld [vmem:[%s1906_s7 + $0xa0] sm:$0xff]  ;;  %v660_v45 = vld [vmem:[%s1906_s7 + $0x8] sm:$0xff]  ;;  %v1138_v43 = vld [vmem:[%s1909_s10 + $0x90] sm:$0xff] }
 0x16d   :  { %764 = vmatpush.msra.mxu3 %v1120_v44  ;;  %727 = vmatpush.msra.mxu2 %v660_v45  ;;  %v813_v44 = vld [vmem:[%s1909_s10 + $0x8] sm:$0xff] }
 0x16e   :  { %428 = vst.msk [vmem:[#allocation6 + $0x18] sm:$0x7f] %vm427_vm4, %v423_v46  ;;  %v1119_v46 = vld [vmem:[%s1906_s7 + $0x98] sm:$0xff]  ;;  %v1127_v45 = vld [vmem:[%s1909_s10 + $0x48] sm:$0xff] }
 0x16f   :  { %765 = vmatpush.msra.mxu3 %v1119_v46  ;;  %v1137_v46 = vld [vmem:[%s1909_s10 + $0x88] sm:$0xff] }
 0x175   :  { %v445_v47 = vld [vmem:[#allocation6 + $0x11] sm:$0xff]  ;;  %v446_v50 = vld [vmem:[#allocation6 + $0x19] sm:$0x3f] }
 0x176   :  { %v540_v48 = vld [vmem:[#allocation6 + $0x12] sm:$0xff]  ;;  %1086 = vmatmul.msk.f32.gmra.mxu3 %vm90_vm0, %v445_v47  ;;  %v541_v51 = vld [vmem:[#allocation6 + $0x1a] sm:$0x3f] }
 0x177   :  { %1102 = vmatmul.msk.f32.gmra.mxu0 %vm90_vm0, %v540_v48  ;;  %v434_v56 = vld [vmem:[#allocation6 + $0x18] sm:$0x3f]  ;;  %v659_v48 = vld [vmem:[%s1906_s7] sm:$0xff] }
 0x178   :  { %v1106_v47 = vld [vmem:[%s1906_s7 + $0x50] sm:$0xff]  ;;  %728 = vmatpush.msra.mxu2 %v659_v48  ;;  %v1126_v48 = vld [vmem:[%s1909_s10 + $0x40] sm:$0xff] }
 0x179   :  { %697 = vmatpush.msrb.mxu1 %v1106_v47  ;;  %v812_v47 = vld [vmem:[%s1909_s10] sm:$0xff] }
 0x17e   :  { %1087 = vmatmul.msk.f32.gmra.mxu3 %vm90_vm0, %v446_v50  ;;  %v1118_v50 = vld [vmem:[%s1906_s7 + $0x90] sm:$0xff] }
 0x17f   :  { %1103 = vmatmul.msk.f32.gmra.mxu0 %vm90_vm0, %v541_v51  ;;  %v1105_v51 = vld [vmem:[%s1906_s7 + $0x48] sm:$0xff]  ;;  %766 = vmatpush.msra.mxu3 %v1118_v50  ;;  %v1136_v50 = vld [vmem:[%s1909_s10 + $0x80] sm:$0xff] }
 0x180   :  { %698 = vmatpush.msrb.mxu1 %v1105_v51 }
 0x186   :  { %1088 = vmatmul.msk.f32.vlgmr.msrb.gmra.mxu3 %vm90_vm0, %v431_v53  ;;  %v1117_v53 = vld [vmem:[%s1906_s7 + $0x88] sm:$0xff] }
 0x187   :  { %767 = vmatpush.msra.mxu3 %v1117_v53 }
 0x18e   :  { %1089 = vmatmul.msk.f32.gmra.mxu3 %vm90_vm0, %v432_v54  ;;  %v1104_v54 = vld [vmem:[%s1906_s7 + $0x40] sm:$0xff] }
 0x18f   :  { %699 = vmatpush.msrb.mxu1 %v1104_v54 }
 0x196   :  { %1090 = vmatmul.msk.f32.gmra.mxu3 %vm90_vm0, %v433_v49  ;;  %v1116_v49 = vld [vmem:[%s1906_s7 + $0x80] sm:$0xff] }
 0x197   :  { %768 = vmatpush.msra.mxu3 %v1116_v49 }
 0x19e   :  { %1091 = vmatmul.msk.f32.gmra.mxu3 %vm90_vm0, %v434_v56 }
 0x1d4   :  { %v580_v55 = vpop.f32.mrf.mxu0 }
 0x1d9   :  { %v485_v57 = vpop.f32.mrf.mxu3 }
 0x1e4   :  { %v583_v2 = vpop.f32.mrf.mxu0 }
 0x1e9   :  { %v488_v52 = vpop.f32.mrf.mxu3 }
 0x1f4   :  { %v586_v8 = vpop.f32.mrf.mxu0 }
 0x1f9   :  { %v491_v58 = vpop.f32.mrf.mxu3 }
 0x1fc   :  { %v589_v20 = vpop.f32.mrf.mxu0 }
 0x201   :  { %v494_v59 = vpop.f32.mrf.mxu3 }
 0x209   :  { %v526_v60 = vpop.f32.mrf.mxu3 }
 0x20a   :  { %v527_v61 = vadd.f32 %v526_v60, %v485_v57 }
 0x20c   :  { %v592_v63 = vadd.f32 %v580_v55, %v527_v61 }
 0x20e   :  { %v600_v0 = vadd.f32 %v1169_v62, %v592_v63 }
 0x210   :  { %v604_v1 = vmax.f32 %v600_v0, 0.0 }
 0x211   :  { %v529_v3 = vpop.f32.mrf.mxu3 }
 0x212   :  { %608 = vst.msk [vmem:[#allocation3] sm:$0xff] %vm90_vm0, %v604_v1  ;;  %v530_v4 = vadd.f32 %v529_v3, %v488_v52 }
 0x214   :  { %v593_v5 = vadd.f32 %v583_v2, %v530_v4 }
 0x216   :  { %v601_v6 = vadd.f32 %v1169_v62, %v593_v5 }
 0x218   :  { %v605_v7 = vmax.f32 %v601_v6, 0.0 }
 0x219   :  { %v532_v9 = vpop.f32.mrf.mxu3 }
 0x21a   :  { %609 = vst.msk [vmem:[#allocation3 + $0x8] sm:$0xff] %vm90_vm0, %v605_v7  ;;  %v533_v10 = vadd.f32 %v532_v9, %v491_v58  ;;  %v1133_v9 = vld [vmem:[%s1909_s10 + $0x78] sm:$0xff] }
 0x21b   :  { %841 = vmatpush.msra.mxu1 %v1133_v9 }
 0x21c   :  { %v594_v11 = vadd.f32 %v586_v8, %v533_v10  ;;  %v819_v8 = vld [vmem:[%s1909_s10 + $0x38] sm:$0xff] }
 0x21d   :  { %v1143_v10 = vld [vmem:[%s1909_s10 + $0xb8] sm:$0xff]  ;;  %864 = vmatpush.msrb.mxu2 %v819_v8 }
 0x21e   :  { %v602_v12 = vadd.f32 %v1169_v62, %v594_v11  ;;  %897 = vmatpush.msrb.mxu3 %v1143_v10 }
 0x220   :  { %v606_v13 = vmax.f32 %v602_v12, 0.0  ;;  %v818_v12 = vld [vmem:[%s1909_s10 + $0x30] sm:$0xff] }
 0x221   :  { %v535_v14 = vpop.f32.mrf.mxu3  ;;  %v612_v15 = vld [vmem:[#allocation3] ss:$2 sm:$0xff]  ;;  %v616_v17 = vld [vmem:[#allocation3 + $0x1] ss:$2 sm:$0xff]  ;;  %865 = vmatpush.msrb.mxu2 %v818_v12 }
 0x222   :  { %610 = vst.msk [vmem:[#allocation3 + $0x10] sm:$0xff] %vm90_vm0, %v606_v13  ;;  %v536_v18 = vadd.f32 %v535_v14, %v494_v59  ;;  %v1634_v19 = vmax.f32 %v612_v15, %v616_v17  ;;  %v1170_v15 = vld [vmem:[%s1907_s8] ss:$0 sm:$0xff]  ;;  %s1207_s8 = smov 112   ;;  %v943_v12 = vld [vmem:[%s1912_s13 + $0x8] sm:$0xff] }
 0x224   :  { %v595_v21 = vadd.f32 %v589_v20, %v536_v18  ;;  %629 = vrot.lane.b32.xlu1 %v1634_v19, %s1204_s5  ;;  %623 = vrot.lane.b32.xlu0 %v1634_v19, %s1205_s1 }
 0x226   :  { %v603_v22 = vadd.f32 %v1169_v62, %v595_v21 }
 0x228   :  { %v607_v23 = vmax.f32 %v603_v22, 0.0 }
 0x22a   :  { %611 = vst.msk [vmem:[#allocation3 + $0x18] sm:$0x3f] %vm338_vm1, %v607_v23 }
 0x22c   :  { %644 = vperm.xlu1 %1166, %v640_v16  }
 0x231   :  { %v614_v30 = vld [vmem:[#allocation3 + $0x10] ss:$2 sm:$0x7f]  ;;  %v618_v31 = vld [vmem:[#allocation3 + $0x11] ss:$2 sm:$0x7f] }
 0x232   :  { %v620_v32 = vmax.f32 %v614_v30, %v618_v31  ;;  %v1132_v30 = vld [vmem:[%s1909_s10 + $0x70] sm:$0xff] }
 0x233   :  { %v1142_v31 = vld [vmem:[%s1909_s10 + $0xb0] sm:$0xff]  ;;  %842 = vmatpush.msra.mxu1 %v1132_v30 }
 0x234   :  { %631 = vrot.lane.b32.xlu0 %v620_v32, %s1204_s5  ;;  %625 = vrot.lane.b32.xlu2 %v620_v32, %s1205_s1 }
 0x235   :  { %898 = vmatpush.msrb.mxu3 %v1142_v31 }
 0x23c   :  { %649 = vperm.xlu2 %1165, %v641_v33   ;;  %v1131_v33 = vld [vmem:[%s1909_s10 + $0x68] sm:$0xff] }
 0x23d   :  { %843 = vmatpush.msra.mxu1 %v1131_v33 }
 0x23f   :  { %844 = vmatpush.msra.mxu1 %v1130_v36  ;;  %v978_v36 = vld [vmem:[%s1914_s15] sm:$0xff] }
 0x241   :  { %845 = vmatpush.msra.mxu1 %v1129_v39 }
 0x243   :  { %846 = vmatpush.msra.mxu1 %v1128_v42 }
 0x244   :  { %805 = vperm.xlu2 %1165, %v802_v34   ;;  %v1141_v34 = vld [vmem:[%s1909_s10 + $0xa8] sm:$0xff] }
 0x245   :  { %899 = vmatpush.msrb.mxu3 %v1141_v34  ;;  %847 = vmatpush.msra.mxu1 %v1127_v45  ;;  %v980_v34 = vld [vmem:[%s1914_s15 + $0x10] sm:$0xff] }
 0x247   :  { %900 = vmatpush.msrb.mxu3 %v1140_v37  ;;  %848 = vmatpush.msra.mxu1 %v1126_v48  ;;  %v1172_v37 = vld [vmem:[%s1913_s14] ss:$0 sm:$0xff] }
 0x249   :  { %901 = vmatpush.msrb.mxu3 %v1139_v40 }
 0x24b   :  { %902 = vmatpush.msrb.mxu3 %v1138_v43 }
 0x24c   :  { %934 = vperm.xlu2 %1165, %v931_v35   ;;  %v816_v35 = vld [vmem:[%s1909_s10 + $0x20] sm:$0xff] }
 0x24d   :  { %903 = vmatpush.msrb.mxu3 %v1137_v46 }
 0x24f   :  { %904 = vmatpush.msrb.mxu3 %v1136_v50 }
 0x28e   :  { %v626_v55 = vpop.permute.xlu2 %625 }
 0x296   :  { %v630_v56 = vpop.permute.xlu1 %629  ;;  %v624_v57 = vpop.permute.xlu0 %623 }
 0x297   :  { %v636_v52 = vsel %vm635_vm5, %v624_v57, %v630_v56  ;;  %v650_v1 = vpop.permute.xlu2 %649 }
 0x298   :  { %v638_v58 = vmax.f32 %v1634_v19, %v636_v52 }
 0x29e   :  { %v645_v59 = vpop.permute.xlu1 %644 }
 0x29f   :  { %v652_v60 = vmul.f32 %v645_v59, %v638_v58  ;;  %v806_v56 = vpop.permute.xlu2 %805 }
 0x2a1   :  { %654 = vst.msk [vmem:[#allocation7] sm:$0xff] %vm90_vm0, %v652_v60  ;;  %v948_v60 = vld [vmem:[%s1912_s13 + $0x30] sm:$0xff] }
 0x2a6   :  { %v632_v61 = vpop.permute.xlu0 %631 }
 0x2a7   :  { %v637_v62 = vsel %vm635_vm5, %v626_v55, %v632_v61  ;;  %v949_v55 = vld [vmem:[%s1912_s13 + $0x38] sm:$0xff]  ;;  %v947_v61 = vld [vmem:[%s1912_s13 + $0x28] sm:$0xff]  ;;  %v935_v30 = vpop.permute.xlu2 %934 }
 0x2a8   :  { %v639_v63 = vmax.f32 %v620_v32, %v637_v62  ;;  %v657_v0 = vld [vmem:[#allocation7] sm:$0xff]  ;;  %v817_v32 = vld [vmem:[%s1909_s10 + $0x28] sm:$0xff]  ;;  %965 = vmatpush.msra.mxu0 %v949_v55  ;;  %v946_v62 = vld [vmem:[%s1912_s13 + $0x20] sm:$0xff] }
 0x2a9   :  { %1114 = vmatmul.msk.f32.vlgmr.msra.gmra.mxu2 %vm90_vm0, %v657_v0 }
 0x2aa   :  { %v653_v2 = vmul.f32 %v650_v1, %v639_v63  ;;  %866 = vmatpush.msrb.mxu2 %v817_v32  ;;  %966 = vmatpush.msra.mxu0 %v948_v60  ;;  %v945_v63 = vld [vmem:[%s1912_s13 + $0x18] sm:$0xff] }
 0x2ab   :  { %v981_v32 = vld [vmem:[%s1914_s15 + $0x18] sm:$0xff] }
 0x2ac   :  { %655 = vst.msk [vmem:[#allocation7 + $0x8] sm:$0x7f] %vm427_vm4, %v653_v2  ;;  %867 = vmatpush.msrb.mxu2 %v816_v35  ;;  %967 = vmatpush.msra.mxu0 %v947_v61  ;;  %v979_v35 = vld [vmem:[%s1914_s15 + $0x8] sm:$0xff] }
 0x2ae   :  { %868 = vmatpush.msrb.mxu2 %v815_v38  ;;  %968 = vmatpush.msra.mxu0 %v946_v62 }
 0x2b0   :  { %869 = vmatpush.msrb.mxu2 %v814_v41  ;;  %969 = vmatpush.msra.mxu0 %v945_v63  ;;  %v1173_v41 = vld [vmem:[%s1915_s16] ss:$0 sm:$0xff] }
 0x2b2   :  { %870 = vmatpush.msrb.mxu2 %v813_v44 }
 0x2b3   :  { %v667_v3 = vld [vmem:[#allocation7 + $0x1] sm:$0xff]  ;;  %v668_v6 = vld [vmem:[#allocation7 + $0x9] sm:$0x3f] }
 0x2b4   :  { %v658_v4 = vld [vmem:[#allocation7 + $0x8] sm:$0x3f]  ;;  %1112 = vmatmul.msk.f32.vlgmr.msrb.gmra.mxu1 %vm90_vm0, %v667_v3  ;;  %871 = vmatpush.msrb.mxu2 %v812_v47 }
 0x2b5   :  { %v736_v5 = vld [vmem:[#allocation7 + $0x2] sm:$0xff]  ;;  %1115 = vmatmul.msk.f32.gmra.mxu2 %vm90_vm0, %v658_v4  ;;  %v737_v7 = vld [vmem:[#allocation7 + $0xa] sm:$0x3f] }
 0x2b6   :  { %1124 = vmatmul.msk.f32.vlgmr.msra.gmra.mxu3 %vm90_vm0, %v736_v5  ;;  %v1171_v3 = vld [vmem:[%s1910_s11] ss:$0 sm:$0xff] }
 0x2bc   :  { %1113 = vmatmul.msk.f32.gmra.mxu1 %vm90_vm0, %v668_v6 }
 0x2be   :  { %1125 = vmatmul.msk.f32.gmra.mxu3 %vm90_vm0, %v737_v7 }
 0x32c   :  { %v730_v13 = vpop.f32.mrf.mxu2 }
 0x331   :  { %v701_v11 = vpop.f32.mrf.mxu1 }
 0x332   :  { %v731_v14 = vadd.f32 %v730_v13, %v701_v11  ;;  %v944_v11 = vld [vmem:[%s1912_s13 + $0x10] sm:$0xff]  ;;  %v942_v13 = vld [vmem:[%s1912_s13] sm:$0xff] }
 0x333   :  { %970 = vmatpush.msra.mxu0 %v944_v11 }
 0x335   :  { %971 = vmatpush.msra.mxu0 %v943_v12 }
 0x337   :  { %972 = vmatpush.msra.mxu0 %v942_v13 }
 0x338   :  { %v733_v22 = vpop.f32.mrf.mxu2 }
 0x339   :  { %v770_v17 = vpop.f32.mrf.mxu3  ;;  %v704_v20 = vpop.f32.mrf.mxu1 }
 0x33a   :  { %v776_v18 = vadd.f32 %v770_v17, %v731_v14  ;;  %v734_v23 = vadd.f32 %v733_v22, %v704_v20  ;;  %v993_v14 = vld [vmem:[%s1914_s15 + $0x78] sm:$0xff]  ;;  %v991_v17 = vld [vmem:[%s1914_s15 + $0x68] sm:$0xff]  ;;  %v988_v20 = vld [vmem:[%s1914_s15 + $0x50] sm:$0xff] }
 0x33b   :  { %998 = vmatpush.msrb.mxu1 %v993_v14  ;;  %v986_v22 = vld [vmem:[%s1914_s15 + $0x40] sm:$0xff] }
 0x33c   :  { %v782_v19 = vadd.f32 %v1170_v15, %v776_v18  ;;  %v990_v18 = vld [vmem:[%s1914_s15 + $0x60] sm:$0xff] }
 0x33e   :  { %v784_v21 = vmax.f32 %v782_v19, 0.0  ;;  %v989_v19 = vld [vmem:[%s1914_s15 + $0x58] sm:$0xff] }
 0x340   :  { %786 = vst.msk [vmem:[#allocation4] sm:$0xff] %vm90_vm0, %v784_v21  ;;  %v987_v21 = vld [vmem:[%s1914_s15 + $0x48] sm:$0xff] }
 0x341   :  { %v773_v16 = vpop.f32.mrf.mxu3 }
 0x342   :  { %v777_v24 = vadd.f32 %v773_v16, %v734_v23  ;;  %v985_v23 = vld [vmem:[%s1914_s15 + $0x38] sm:$0xff]  ;;  %v984_v16 = vld [vmem:[%s1914_s15 + $0x30] sm:$0xff] }
 0x344   :  { %v783_v25 = vadd.f32 %v1170_v15, %v777_v24  ;;  %v992_v15 = vld [vmem:[%s1914_s15 + $0x70] sm:$0xff] }
 0x345   :  { %999 = vmatpush.msrb.mxu1 %v992_v15 }
 0x346   :  { %v785_v26 = vmax.f32 %v783_v25, 0.0 }
 0x347   :  { %1000 = vmatpush.msrb.mxu1 %v991_v17 }
 0x348   :  { %787 = vst.msk [vmem:[#allocation4 + $0x8] sm:$0x3f] %vm338_vm1, %v785_v26  ;;  %v983_v26 = vld [vmem:[%s1914_s15 + $0x28] sm:$0xff] }
 0x349   :  { %1001 = vmatpush.msrb.mxu1 %v990_v18 }
 0x34b   :  { %1002 = vmatpush.msrb.mxu1 %v989_v19 }
 0x34d   :  { %1003 = vmatpush.msrb.mxu1 %v988_v20 }
 0x34f   :  { %v788_v27 = vld [vmem:[#allocation4] ss:$2 sm:$0x7f]  ;;  %v790_v28 = vld [vmem:[#allocation4 + $0x1] ss:$2 sm:$0x7f]  ;;  %1004 = vmatpush.msrb.mxu1 %v987_v21 }
 0x350   :  { %v791_v29 = vmax.f32 %v788_v27, %v790_v28 }
 0x351   :  { %1005 = vmatpush.msrb.mxu1 %v986_v22 }
 0x352   :  { %796 = vrot.lane.b32.xlu1 %v791_v29, %s1206_s26  ;;  %793 = vrot.lane.b32.xlu0 %v791_v29, %s1207_s8 }
 0x353   :  { %1006 = vmatpush.msrb.mxu1 %v985_v23 }
 0x355   :  { %1007 = vmatpush.msrb.mxu1 %v984_v16 }
 0x357   :  { %1008 = vmatpush.msrb.mxu1 %v983_v26 }
 0x3c4   :  { %v797_v51 = vpop.permute.xlu1 %796  ;;  %v794_v53 = vpop.permute.xlu0 %793 }
 0x3c5   :  { %v800_v54 = vsel %vm799_vm6, %v794_v53, %v797_v51 }
 0x3c6   :  { %v801_v49 = vmax.f32 %v791_v29, %v800_v54  ;;  %v982_v29 = vld [vmem:[%s1914_s15 + $0x20] sm:$0xff] }
 0x3c7   :  { %1009 = vmatpush.msrb.mxu1 %v982_v29 }
 0x3c8   :  { %v808_v57 = vmul.f32 %v806_v56, %v801_v49 }
 0x3c9   :  { %1010 = vmatpush.msrb.mxu1 %v981_v32 }
 0x3ca   :  { %809 = vst.msk [vmem:[#allocation8] sm:$0x7f] %vm427_vm4, %v808_v57 }
 0x3cb   :  { %1011 = vmatpush.msrb.mxu1 %v980_v34 }
 0x3cd   :  { %1012 = vmatpush.msrb.mxu1 %v979_v35 }
 0x3cf   :  { %1013 = vmatpush.msrb.mxu1 %v978_v36 }
 0x3d1   :  { %v820_v52 = vld [vmem:[#allocation8 + $0x1] sm:$0x3f] }
 0x3d2   :  { %v811_v58 = vld [vmem:[#allocation8] sm:$0x3f]  ;;  %1134 = vmatmul.msk.f32.vlgmr.msra.gmra.mxu1 %vm90_vm0, %v820_v52 }
 0x3d3   :  { %v876_v59 = vld [vmem:[#allocation8 + $0x2] sm:$0x3f]  ;;  %1135 = vmatmul.msk.f32.vlgmr.msrb.gmra.mxu2 %vm90_vm0, %v811_v58 }
 0x3d4   :  { %1144 = vmatmul.msk.f32.vlgmr.msrb.gmra.mxu3 %vm90_vm0, %v876_v59 }
 0x44f   :  { %v850_v0 = vpop.f32.mrf.mxu1 }
 0x456   :  { %v873_v1 = vpop.f32.mrf.mxu2 }
 0x457   :  { %v874_v2 = vadd.f32 %v873_v1, %v850_v0  ;;  %v906_v4 = vpop.f32.mrf.mxu3 }
 0x459   :  { %v909_v5 = vadd.f32 %v906_v4, %v874_v2 }
 0x45b   :  { %v914_v6 = vadd.f32 %v1171_v3, %v909_v5 }
 0x45d   :  { %v915_v7 = vmax.f32 %v914_v6, 0.0 }
 0x45f   :  { %916 = vst.msk [vmem:[#allocation5] sm:$0x3f] %vm338_vm1, %v915_v7 }
 0x466   :  { %v917_v8 = vld [vmem:[#allocation5] ss:$2 sm:$0x7]  ;;  %v919_v9 = vld [vmem:[#allocation5 + $0x1] ss:$2 sm:$0x7] }
 0x467   :  { %v920_v10 = vmax.f32 %v917_v8, %v919_v9 }
 0x469   :  { %925 = vrot.lane.b32.xlu1 %v920_v10, %s1208_s23  ;;  %922 = vrot.lane.b32.xlu0 %v920_v10, %s1209_s9 }
 0x4db   :  { %v926_v24 = vpop.permute.xlu1 %925  ;;  %v923_v25 = vpop.permute.xlu0 %922 }
 0x4dc   :  { %v929_v27 = vsel %vm928_vm7, %v923_v25, %v926_v24 }
 0x4dd   :  { %v930_v28 = vmax.f32 %v920_v10, %v929_v27 }
 0x4df   :  { %v937_v31 = vmul.f32 %v935_v30, %v930_v28 }
 0x4e1   :  { %939 = vst.msk [vmem:[#allocation9] sm:$0x7] %vm938_vm8, %v937_v31 }
 0x4e8   :  { %v941_v33 = vld [vmem:[#allocation9] ss:$2 sm:$0x3] }
 0x4e9   :  { %1145 = vmatmul.msk.f32.vlgmr.msra.gmra.mxu0 %vm90_vm0, %v941_v33 }
 0x566   :  { %v974_v38 = vpop.f32.mrf.mxu0 }
 0x567   :  { %v975_v39 = vadd.f32 %v1172_v37, %v974_v38 }
 0x569   :  { %v977_v40 = vmax.f32 %v975_v39, 0.0 }
 0x56b   :  { %1014 = vmatmul.f32.vlgmr.msrb.gmra.mxu1 %v977_v40 }
 0x5e8   :  { %v1015_v42 = vpop.f32.mrf.mxu1 }
 0x5e9   :  { %v1016_v43 = vadd.f32 %v1173_v41, %v1015_v42 }
 0x5eb   :  { %1019 = vst.msk [vmem:[#allocation10] sm:$0x3] %vm1018_vm9, %v1016_v43 }
 0x5ec   :  { %1030 = dma.vmem_to_hbm [thread:$0]  %s1026_s20, 32, %s1028_s22, [#allocation11]  }
 0x5ed   :  { %1198 = dma.done.wait [#allocation11], 32  }
 0x5ee   :  { %1199 = vsyncadd [#allocation11], 4294967264 }
 0x5ef   :  { %1035 = vsyncpa [#allocation11], 1 }

</bundles_post_ra>
